<compile_context>
chip_gen: v6e
topology: v6e:2x2x1
jax: 0.10.0
libtpu: 0.0.40
codegen_flags: <defaults>
</compile_context>

<pallas_src>
import jax
import jax.numpy as jnp
from jax.experimental import pallas as pl
from jax.experimental.pallas import tpu as pltpu

# ---- synthetic backbone hyper-parameters (small, consistent with forward) ----
VOCAB   = 64         # vocab size
MAX_POS = 32         # max position embeddings
B, S, H = 2, 8, 32   # batch, sequence length, hidden size
NH, DH  = 4, 8       # num heads, head dim (NH * DH == H)
INTER   = 64         # FFN intermediate size
LAYERS  = 2          # encoder layers
EPS     = 1e-5       # layernorm eps (RoBERTa default)
PAD_IDX = 1          # RoBERTa padding_idx (position-id offset)
CLS_PAD = 128        # lane-dense padded classifier output width (real logits = 2)

M = B * S            # 16 rows: sublane-dense 2-D shape for all projections/FFN
G = NH * B           # 8 (head, batch) groups for batched attention
HV_ROWS = 2 + 6 * LAYERS   # emb LN (2) + per layer [ln1_g, ln1_b, ln2_g, ln2_b, bo, b2]


def _layernorm(x, gamma, beta):
    mean = jnp.mean(x, axis=-1, keepdims=True)
    var = jnp.mean((x - mean) ** 2, axis=-1, keepdims=True)
    return (x - mean) * jax.lax.rsqrt(var + EPS) * gamma + beta


def _erf(x):
    # Abramowitz & Stegun 7.1.26 polynomial erf (max abs err ~1.5e-7); uses only
    # exp / mul / add / div / where which all lower on the TPU VPU/EUP.
    # TODO(synk): lax.erf may not have a Mosaic lowering rule, so exact erf-GELU
    # is emulated with this polynomial instead of jax.nn.gelu(approximate=False).
    a1, a2, a3, a4, a5 = 0.254829592, -0.284496736, 1.421413741, -1.453152027, 1.061405429
    p = 0.3275911
    ax = jnp.abs(x)
    t = 1.0 / (1.0 + p * ax)
    poly = ((((a5 * t + a4) * t + a3) * t + a2) * t + a1) * t
    y = 1.0 - poly * jnp.exp(-ax * ax)
    return jnp.where(x >= 0, y, -y)


def _gelu_erf(x):
    return 0.5 * x * (1.0 + _erf(x * 0.7071067811865476))


# --------------------------- fused forward kernel ----------------------------
def fused_xlmr_kernel(x_emb_ref, mask_ref, hvec_ref, bqkv_ref, b1_ref,
                      wqkv_ref, wo_ref, w1_ref, w2_ref, cls_ref, out_ref):
    # Embedding LayerNorm fused in (gather stays in plain JAX).
    x2 = _layernorm(x_emb_ref[...], hvec_ref[0], hvec_ref[1])         # (M, H)
    mask = mask_ref[...]                                              # (G, S, S), pre-broadcast

    for l in range(LAYERS):   # static unroll (grid collapsed to a single step)
        base = 2 + 6 * l
        ln1_g, ln1_b = hvec_ref[base + 0], hvec_ref[base + 1]
        ln2_g, ln2_b = hvec_ref[base + 2], hvec_ref[base + 3]
        bo,    b2    = hvec_ref[base + 4], hvec_ref[base + 5]

        # ---- fused per-head QKV projection: one batched (3*NH) contraction ----
        # Heads were folded into the batch dim at weight-pack time; 1/sqrt(DH)
        # is folded into the Q weights/bias.
        xb = jnp.broadcast_to(x2[None], (3 * NH, M, H))
        qkv = jnp.einsum('nmh,nhd->nmd', xb, wqkv_ref[l],
                         preferred_element_type=jnp.float32) + bqkv_ref[l]  # (3NH, M, DH)
        q = qkv[0:NH].reshape(G, S, DH)            # leading-dim regroup only
        k = qkv[NH:2 * NH].reshape(G, S, DH)
        v = qkv[2 * NH:3 * NH].reshape(G, S, DH)

        # ---- attention, all heads batched along the leading dim ----
        s = jnp.einsum('gqd,gkd->gqk', q, k,
                       preferred_element_type=jnp.float32) + mask
        p = jnp.exp(s - jnp.max(s, axis=-1, keepdims=True))
        p = p * pl.reciprocal(jnp.sum(p, axis=-1, keepdims=True), approx=True)
        ctx = jnp.einsum('gqk,gkd->gqd', p, v,
                         preferred_element_type=jnp.float32)          # (G, S, DH)

        # ---- attention output projection: per-head partials summed over heads
        #      (avoids re-concatenating heads along lanes) ----
        ctx_h = ctx.reshape(NH, M, DH)
        part = jnp.einsum('nmd,ndh->nmh', ctx_h, wo_ref[l],
                          preferred_element_type=jnp.float32)         # (NH, M, H)
        attn = part[0]
        for n in range(1, NH):
            attn = attn + part[n]
        attn = attn + bo

        # residual + post-LN (RoBERTa style); dropout = identity at inference
        h1 = _layernorm(x2 + attn, ln1_g, ln1_b)

        # ---- feed-forward ----
        ff = jnp.dot(h1, w1_ref[l], preferred_element_type=jnp.float32) + b1_ref[l]
        ff = _gelu_erf(ff)
        ff = jnp.dot(ff, w2_ref[l], preferred_element_type=jnp.float32) + b2
        x2 = _layernorm(h1 + ff, ln2_g, ln2_b)

    # ---- CLS token -> (dropout = identity) -> Linear, lane-dense padded out ----
    cls = jnp.concatenate([x2[b * S:b * S + 1, :] for b in range(B)], axis=0)  # (B, H)
    out_ref[...] = (jnp.dot(cls, cls_ref[0:H, :],
                            preferred_element_type=jnp.float32)
                    + cls_ref[H:H + B, :])


def _cost_estimate():
    mm = lambda m, k, n: 2 * m * k * n
    per_layer = (3 * NH * mm(M, H, DH)                    # batched per-head QKV
                 + G * (mm(S, DH, S) + mm(S, S, DH))      # scores + ctx
                 + NH * mm(M, DH, H)                      # out-proj partials
                 + mm(M, H, INTER) + mm(M, INTER, H))     # FFN
    flops = LAYERS * per_layer + mm(B, H, CLS_PAD)
    transcendentals = LAYERS * (G * S * S + G * S + 2 * M * INTER + 3 * M) + 2 * M
    in_elems = (M * H + G * S * S + HV_ROWS * M * H
                + LAYERS * (3 * NH * M * DH + M * INTER + 3 * NH * H * DH
                            + NH * DH * H + H * INTER + INTER * H)
                + (H + 8) * CLS_PAD)
    bytes_accessed = 4 * (in_elems + B * CLS_PAD)
    return pl.CostEstimate(flops=flops, transcendentals=transcendentals,
                           bytes_accessed=bytes_accessed)


def _full_spec(shape):
    # No grid: every operand is a single full-array VMEM block.
    return pl.BlockSpec(shape, lambda *args: (0,) * len(shape))


def fused_forward_call(x_emb2, mask_gss, p):
    in_specs = [
        _full_spec((M, H)),                        # embeddings (pre-LN), (B*S, H)
        _full_spec((G, S, S)),                     # additive mask, pre-broadcast
        _full_spec((HV_ROWS, M, H)),               # packed H-wide vector slab
        _full_spec((LAYERS, 3 * NH, M, DH)),       # QKV bias (head-stacked, row-broadcast)
        _full_spec((LAYERS, M, INTER)),            # FFN b1 (row-broadcast)
        _full_spec((LAYERS, 3 * NH, H, DH)),       # QKV weights (head-stacked, Q scaled)
        _full_spec((LAYERS, NH, DH, H)),           # attn out-proj weights (head-stacked)
        _full_spec((LAYERS, H, INTER)),            # FFN w1
        _full_spec((LAYERS, INTER, H)),            # FFN w2
        _full_spec((H + 8, CLS_PAD)),              # classifier weight+bias (lane-dense pad)
    ]
    return pl.pallas_call(
        fused_xlmr_kernel,
        out_shape=jax.ShapeDtypeStruct((B, CLS_PAD), jnp.float32),
        in_specs=in_specs,
        out_specs=_full_spec((B, CLS_PAD)),
        compiler_params=pltpu.CompilerParams(vmem_limit_bytes=32 * 1024 * 1024),
        cost_estimate=_cost_estimate(),
    )(x_emb2, mask_gss, p['hvec'], p['bqkv_b'], p['b1_b'],
      p['wqkv_h'], p['wo_h'], p['w1'], p['w2'], p['cls_pack'])


# ------------------------------- parameters ----------------------------------
def init_params(key):
    ks = jax.random.split(key, 10)
    dense = lambda k, shape: jax.random.normal(k, shape, jnp.float32) * 0.02
    scale = DH ** -0.5

    # --- natural (PyTorch-like) parameters ---
    wq = dense(ks[0], (LAYERS, H, H)); bq = jnp.zeros((LAYERS, H), jnp.float32)
    wk = dense(ks[1], (LAYERS, H, H)); bk = jnp.zeros((LAYERS, H), jnp.float32)
    wv = dense(ks[2], (LAYERS, H, H)); bv = jnp.zeros((LAYERS, H), jnp.float32)
    wo = dense(ks[3], (LAYERS, H, H)); bo = jnp.zeros((LAYERS, H), jnp.float32)
    w1 = dense(ks[4], (LAYERS, H, INTER)); b1 = jnp.zeros((LAYERS, INTER), jnp.float32)
    w2 = dense(ks[5], (LAYERS, INTER, H)); b2 = jnp.zeros((LAYERS, H), jnp.float32)
    ln1_g = jnp.ones((LAYERS, H), jnp.float32); ln1_b = jnp.zeros((LAYERS, H), jnp.float32)
    ln2_g = jnp.ones((LAYERS, H), jnp.float32); ln2_b = jnp.zeros((LAYERS, H), jnp.float32)
    emb_g = jnp.ones((H,), jnp.float32); emb_b = jnp.zeros((H,), jnp.float32)
    cls_w = dense(ks[6], (H, 2)); cls_b = jnp.zeros((2,), jnp.float32)

    # --- pack into kernel slabs (all packing is trace-time JAX, outside kernel) ---
    def heads_cols(w):   # (L, H, H): split output columns per head -> (L, NH, H, DH)
        return w.reshape(LAYERS, H, NH, DH).transpose(0, 2, 1, 3)

    # Attention scale folded into Q weight AND Q bias (equivalent forward).
    wqkv_h = jnp.concatenate([heads_cols(wq) * scale, heads_cols(wk), heads_cols(wv)],
                             axis=1)                                   # (L, 3NH, H, DH)
    bqkv_h = jnp.concatenate([(bq * scale).reshape(LAYERS, NH, DH),
                              bk.reshape(LAYERS, NH, DH),
                              bv.reshape(LAYERS, NH, DH)], axis=1)     # (L, 3NH, DH)
    bqkv_b = jnp.broadcast_to(bqkv_h[:, :, None, :], (LAYERS, 3 * NH, M, DH))

    wo_h = wo.reshape(LAYERS, NH, DH, H)                               # rows grouped per head

    def bcast_rows(v):   # (..., W) -> (..., M, W): pre-broadcast over the M rows
        return jnp.broadcast_to(v[..., None, :], v.shape[:-1] + (M, v.shape[-1]))

    rows = [bcast_rows(emb_g), bcast_rows(emb_b)]
    for l in range(LAYERS):
        rows += [bcast_rows(ln1_g[l]), bcast_rows(ln1_b[l]),
                 bcast_rows(ln2_g[l]), bcast_rows(ln2_b[l]),
                 bcast_rows(bo[l]), bcast_rows(b2[l])]
    hvec = jnp.stack(rows, axis=0)                                     # (2+6L, M, H)

    b1_b = bcast_rows(b1)                                              # (L, M, INTER)

    cls_pack = jnp.zeros((H + 8, CLS_PAD), jnp.float32)
    cls_pack = cls_pack.at[:H, :2].set(cls_w)
    cls_pack = cls_pack.at[H:H + B, :2].set(jnp.broadcast_to(cls_b[None, :], (B, 2)))

    return {
        'word_emb': dense(ks[7], (VOCAB, H)),
        'pos_emb': dense(ks[8], (MAX_POS, H)),
        'type_emb': dense(ks[9], (1, H)),
        'wqkv_h': wqkv_h, 'bqkv_b': bqkv_b, 'wo_h': wo_h,
        'w1': w1, 'b1_b': b1_b, 'w2': w2,
        'hvec': hvec, 'cls_pack': cls_pack,
    }


# --------------------------------- forward -----------------------------------
@jax.jit
def xlmr_classifier_forward(params, input_ids, attention_mask):
    # Glue (plain JAX): embedding gathers only.  LayerNorms run in the kernel.
    # HF RoBERTa position ids: cumsum over (input_ids != padding_idx) + padding_idx.
    not_pad = (input_ids != PAD_IDX).astype(jnp.int32)
    position_ids = jnp.cumsum(not_pad, axis=1) * not_pad + PAD_IDX
    x_emb = (params['word_emb'][input_ids]
             + params['pos_emb'][position_ids]
             + params['type_emb'][0][None, None, :])
    x_emb2 = x_emb.reshape(M, H)

    # Additive attention mask pre-broadcast (hoisted) to the head-batched
    # (NH*B, S, S) score shape used inside the kernel; 0 attended, -1e9 padded.
    add_mask = (1.0 - attention_mask.astype(jnp.float32)) * -1e9            # (B, S)
    mask_gss = jnp.broadcast_to(add_mask[None, :, None, :], (NH, B, S, S)).reshape(G, S, S)

    out_pad = fused_forward_call(x_emb2, mask_gss, params)                  # (B, 128)
    return out_pad[:, :2]                                                   # Linear(hidden, 2)


if __name__ == "__main__":
    key = jax.random.PRNGKey(0)
    k_param, k_ids = jax.random.split(key)

    params = init_params(k_param)
    input_ids = jax.random.randint(k_ids, (B, S), 0, VOCAB, dtype=jnp.int32)
    attention_mask = jnp.ones((B, S), dtype=jnp.int32)
    attention_mask = attention_mask.at[1, -2:].set(0)   # some padding in row 1

    logits = xlmr_classifier_forward(params, input_ids, attention_mask)
    jax.block_until_ready(logits)
    assert logits.shape == (B, 2) and logits.dtype == jnp.float32
    print("KERNEL_OK")
</pallas_src>

<mosaic_0001>
module attributes {stable_mosaic.version = 11 : i64} {
  func.func @fused_xlmr_kernel(%arg0: memref<16x32xf32, #tpu.memory_space<vmem>>, %arg1: memref<8x8x8xf32, #tpu.memory_space<vmem>>, %arg2: memref<14x16x32xf32, #tpu.memory_space<vmem>>, %arg3: memref<2x12x16x8xf32, #tpu.memory_space<vmem>>, %arg4: memref<2x16x64xf32, #tpu.memory_space<vmem>>, %arg5: memref<2x12x32x8xf32, #tpu.memory_space<vmem>>, %arg6: memref<2x4x8x32xf32, #tpu.memory_space<vmem>>, %arg7: memref<2x32x64xf32, #tpu.memory_space<vmem>>, %arg8: memref<2x64x32xf32, #tpu.memory_space<vmem>>, %arg9: memref<40x128xf32, #tpu.memory_space<vmem>>, %arg10: memref<2x128xf32, #tpu.memory_space<vmem>>) attributes {dimension_semantics = [], scalar_prefetch = 0 : i64, scratch_operands = 0 : i64, tpu.core_type = #tpu.core_type<tc>} {
    %c0 = arith.constant 0 : index
    %c0_0 = arith.constant 0 : index
    %0 = vector.load %arg0[%c0, %c0_0] : memref<16x32xf32, #tpu.memory_space<vmem>>, vector<16x32xf32>
    %c0_1 = arith.constant 0 : index
    %c0_2 = arith.constant 0 : index
    %c0_3 = arith.constant 0 : index
    %1 = vector.load %arg2[%c0_1, %c0_2, %c0_3] : memref<14x16x32xf32, #tpu.memory_space<vmem>>, vector<1x16x32xf32>
    %2 = vector.shape_cast %1 : vector<1x16x32xf32> to vector<16x32xf32>
    %c1 = arith.constant 1 : index
    %c0_4 = arith.constant 0 : index
    %c0_5 = arith.constant 0 : index
    %3 = vector.load %arg2[%c1, %c0_4, %c0_5] : memref<14x16x32xf32, #tpu.memory_space<vmem>>, vector<1x16x32xf32>
    %4 = vector.shape_cast %3 : vector<1x16x32xf32> to vector<16x32xf32>
    %cst = arith.constant dense<0.000000e+00> : vector<16xf32>
    %5 = vector.multi_reduction <add>, %0, %cst [1] : vector<16x32xf32> to vector<16xf32>
    %6 = vector.shape_cast %5 : vector<16xf32> to vector<16x1xf32>
    %cst_6 = arith.constant 3.200000e+01 : f32
    %7 = vector.broadcast %cst_6 : f32 to vector<16x1xf32>
    %8 = arith.divf %6, %7 : vector<16x1xf32>
    %9 = vector.broadcast %8 : vector<16x1xf32> to vector<16x32xf32>
    %10 = arith.subf %0, %9 : vector<16x32xf32>
    %11 = arith.mulf %10, %10 : vector<16x32xf32>
    %cst_7 = arith.constant dense<0.000000e+00> : vector<16xf32>
    %12 = vector.multi_reduction <add>, %11, %cst_7 [1] : vector<16x32xf32> to vector<16xf32>
    %13 = vector.shape_cast %12 : vector<16xf32> to vector<16x1xf32>
    %cst_8 = arith.constant 3.200000e+01 : f32
    %14 = vector.broadcast %cst_8 : f32 to vector<16x1xf32>
    %15 = arith.divf %13, %14 : vector<16x1xf32>
    %16 = vector.broadcast %8 : vector<16x1xf32> to vector<16x32xf32>
    %17 = arith.subf %0, %16 : vector<16x32xf32>
    %cst_9 = arith.constant 9.99999974E-6 : f32
    %18 = vector.broadcast %cst_9 : f32 to vector<16x1xf32>
    %19 = arith.addf %15, %18 : vector<16x1xf32>
    %20 = math.rsqrt %19 : vector<16x1xf32>
    %21 = vector.broadcast %20 : vector<16x1xf32> to vector<16x32xf32>
    %22 = arith.mulf %17, %21 : vector<16x32xf32>
    %23 = arith.mulf %22, %2 : vector<16x32xf32>
    %24 = arith.addf %23, %4 : vector<16x32xf32>
    %c0_10 = arith.constant 0 : index
    %c0_11 = arith.constant 0 : index
    %c0_12 = arith.constant 0 : index
    %25 = vector.load %arg1[%c0_10, %c0_11, %c0_12] : memref<8x8x8xf32, #tpu.memory_space<vmem>>, vector<8x8x8xf32>
    %c2 = arith.constant 2 : index
    %c0_13 = arith.constant 0 : index
    %c0_14 = arith.constant 0 : index
    %26 = vector.load %arg2[%c2, %c0_13, %c0_14] : memref<14x16x32xf32, #tpu.memory_space<vmem>>, vector<1x16x32xf32>
    %27 = vector.shape_cast %26 : vector<1x16x32xf32> to vector<16x32xf32>
    %c3 = arith.constant 3 : index
    %c0_15 = arith.constant 0 : index
    %c0_16 = arith.constant 0 : index
    %28 = vector.load %arg2[%c3, %c0_15, %c0_16] : memref<14x16x32xf32, #tpu.memory_space<vmem>>, vector<1x16x32xf32>
    %29 = vector.shape_cast %28 : vector<1x16x32xf32> to vector<16x32xf32>
    %c4 = arith.constant 4 : index
    %c0_17 = arith.constant 0 : index
    %c0_18 = arith.constant 0 : index
    %30 = vector.load %arg2[%c4, %c0_17, %c0_18] : memref<14x16x32xf32, #tpu.memory_space<vmem>>, vector<1x16x32xf32>
    %31 = vector.shape_cast %30 : vector<1x16x32xf32> to vector<16x32xf32>
    %c5 = arith.constant 5 : index
    %c0_19 = arith.constant 0 : index
    %c0_20 = arith.constant 0 : index
    %32 = vector.load %arg2[%c5, %c0_19, %c0_20] : memref<14x16x32xf32, #tpu.memory_space<vmem>>, vector<1x16x32xf32>
    %33 = vector.shape_cast %32 : vector<1x16x32xf32> to vector<16x32xf32>
    %c6 = arith.constant 6 : index
    %c0_21 = arith.constant 0 : index
    %c0_22 = arith.constant 0 : index
    %34 = vector.load %arg2[%c6, %c0_21, %c0_22] : memref<14x16x32xf32, #tpu.memory_space<vmem>>, vector<1x16x32xf32>
    %35 = vector.shape_cast %34 : vector<1x16x32xf32> to vector<16x32xf32>
    %c7 = arith.constant 7 : index
    %c0_23 = arith.constant 0 : index
    %c0_24 = arith.constant 0 : index
    %36 = vector.load %arg2[%c7, %c0_23, %c0_24] : memref<14x16x32xf32, #tpu.memory_space<vmem>>, vector<1x16x32xf32>
    %37 = vector.shape_cast %36 : vector<1x16x32xf32> to vector<16x32xf32>
    %38 = vector.shape_cast %24 : vector<16x32xf32> to vector<1x16x32xf32>
    %39 = vector.shape_cast %38 : vector<1x16x32xf32> to vector<1x16x32xf32>
    %40 = vector.broadcast %39 : vector<1x16x32xf32> to vector<12x16x32xf32>
    %c0_25 = arith.constant 0 : index
    %c0_26 = arith.constant 0 : index
    %c0_27 = arith.constant 0 : index
    %c0_28 = arith.constant 0 : index
    %41 = vector.load %arg5[%c0_25, %c0_26, %c0_27, %c0_28] : memref<2x12x32x8xf32, #tpu.memory_space<vmem>>, vector<1x12x32x8xf32>
    %42 = vector.shape_cast %41 : vector<1x12x32x8xf32> to vector<12x32x8xf32>
    "tpu.trace_start"() <{level = 10 : i32, message = "nmh,nhd->nmd"}> : () -> ()
    %cst_29 = arith.constant dense<0.000000e+00> : vector<12x16x8xf32>
    %43 = tpu.matmul %40, %42, %cst_29 {dimension_numbers = #tpu.dot_dimension_numbers<[2], [1], [1], [2], [0, 0, 0, 1, 1, 2], [0], [0]>} : vector<12x16x32xf32>, vector<12x32x8xf32>, vector<12x16x8xf32> -> vector<12x16x8xf32>
    "tpu.trace_stop"() : () -> ()
    %c0_30 = arith.constant 0 : index
    %c0_31 = arith.constant 0 : index
    %c0_32 = arith.constant 0 : index
    %c0_33 = arith.constant 0 : index
    %44 = vector.load %arg3[%c0_30, %c0_31, %c0_32, %c0_33] : memref<2x12x16x8xf32, #tpu.memory_space<vmem>>, vector<1x12x16x8xf32>
    %45 = vector.shape_cast %44 : vector<1x12x16x8xf32> to vector<12x16x8xf32>
    %46 = arith.addf %43, %45 : vector<12x16x8xf32>
    %47 = vector.extract_strided_slice %46 {offsets = [0, 0, 0], sizes = [4, 16, 8], strides = [1, 1, 1]} : vector<12x16x8xf32> to vector<4x16x8xf32>
    %48 = vector.shape_cast %47 : vector<4x16x8xf32> to vector<8x8x8xf32>
    %49 = vector.extract_strided_slice %46 {offsets = [4, 0, 0], sizes = [4, 16, 8], strides = [1, 1, 1]} : vector<12x16x8xf32> to vector<4x16x8xf32>
    %50 = vector.shape_cast %49 : vector<4x16x8xf32> to vector<8x8x8xf32>
    %51 = vector.extract_strided_slice %46 {offsets = [8, 0, 0], sizes = [4, 16, 8], strides = [1, 1, 1]} : vector<12x16x8xf32> to vector<4x16x8xf32>
    %52 = vector.shape_cast %51 : vector<4x16x8xf32> to vector<8x8x8xf32>
    "tpu.trace_start"() <{level = 10 : i32, message = "gqd,gkd->gqk"}> : () -> ()
    %cst_34 = arith.constant dense<0.000000e+00> : vector<8x8x8xf32>
    %53 = tpu.matmul %48, %50, %cst_34 {dimension_numbers = #tpu.dot_dimension_numbers<[2], [2], [1], [1], [0, 0, 0, 1, 1, 1], [0], [0]>} : vector<8x8x8xf32>, vector<8x8x8xf32>, vector<8x8x8xf32> -> vector<8x8x8xf32>
    "tpu.trace_stop"() : () -> ()
    %54 = arith.addf %53, %25 : vector<8x8x8xf32>
    %cst_35 = arith.constant dense<0xFF800000> : vector<8x8xf32>
    %55 = vector.multi_reduction <maximumf>, %54, %cst_35 [2] : vector<8x8x8xf32> to vector<8x8xf32>
    %56 = vector.shape_cast %55 : vector<8x8xf32> to vector<8x8x1xf32>
    %57 = vector.broadcast %56 : vector<8x8x1xf32> to vector<8x8x8xf32>
    %58 = arith.subf %54, %57 : vector<8x8x8xf32>
    %59 = math.exp %58 : vector<8x8x8xf32>
    %cst_36 = arith.constant dense<0.000000e+00> : vector<8x8xf32>
    %60 = vector.multi_reduction <add>, %59, %cst_36 [2] : vector<8x8x8xf32> to vector<8x8xf32>
    %61 = vector.shape_cast %60 : vector<8x8xf32> to vector<8x8x1xf32>
    %62 = tpu.reciprocal %61 {approx = true} : vector<8x8x1xf32> -> vector<8x8x1xf32>
    %63 = vector.broadcast %62 : vector<8x8x1xf32> to vector<8x8x8xf32>
    %64 = arith.mulf %59, %63 : vector<8x8x8xf32>
    "tpu.trace_start"() <{level = 10 : i32, message = "gqk,gkd->gqd"}> : () -> ()
    %cst_37 = arith.constant dense<0.000000e+00> : vector<8x8x8xf32>
    %65 = tpu.matmul %64, %52, %cst_37 {dimension_numbers = #tpu.dot_dimension_numbers<[2], [1], [1], [2], [0, 0, 0, 1, 1, 2], [0], [0]>} : vector<8x8x8xf32>, vector<8x8x8xf32>, vector<8x8x8xf32> -> vector<8x8x8xf32>
    "tpu.trace_stop"() : () -> ()
    %66 = vector.shape_cast %65 : vector<8x8x8xf32> to vector<4x16x8xf32>
    %c0_38 = arith.constant 0 : index
    %c0_39 = arith.constant 0 : index
    %c0_40 = arith.constant 0 : index
    %c0_41 = arith.constant 0 : index
    %67 = vector.load %arg6[%c0_38, %c0_39, %c0_40, %c0_41] : memref<2x4x8x32xf32, #tpu.memory_space<vmem>>, vector<1x4x8x32xf32>
    %68 = vector.shape_cast %67 : vector<1x4x8x32xf32> to vector<4x8x32xf32>
    "tpu.trace_start"() <{level = 10 : i32, message = "nmd,ndh->nmh"}> : () -> ()
    %cst_42 = arith.constant dense<0.000000e+00> : vector<4x16x32xf32>
    %69 = tpu.matmul %66, %68, %cst_42 {dimension_numbers = #tpu.dot_dimension_numbers<[2], [1], [1], [2], [0, 0, 0, 1, 1, 2], [0], [0]>} : vector<4x16x8xf32>, vector<4x8x32xf32>, vector<4x16x32xf32> -> vector<4x16x32xf32>
    "tpu.trace_stop"() : () -> ()
    %70 = vector.extract_strided_slice %69 {offsets = [0, 0, 0], sizes = [1, 16, 32], strides = [1, 1, 1]} : vector<4x16x32xf32> to vector<1x16x32xf32>
    %71 = vector.shape_cast %70 : vector<1x16x32xf32> to vector<16x32xf32>
    %72 = vector.extract_strided_slice %69 {offsets = [1, 0, 0], sizes = [1, 16, 32], strides = [1, 1, 1]} : vector<4x16x32xf32> to vector<1x16x32xf32>
    %73 = vector.shape_cast %72 : vector<1x16x32xf32> to vector<16x32xf32>
    %74 = arith.addf %71, %73 : vector<16x32xf32>
    %75 = vector.extract_strided_slice %69 {offsets = [2, 0, 0], sizes = [1, 16, 32], strides = [1, 1, 1]} : vector<4x16x32xf32> to vector<1x16x32xf32>
    %76 = vector.shape_cast %75 : vector<1x16x32xf32> to vector<16x32xf32>
    %77 = arith.addf %74, %76 : vector<16x32xf32>
    %78 = vector.extract_strided_slice %69 {offsets = [3, 0, 0], sizes = [1, 16, 32], strides = [1, 1, 1]} : vector<4x16x32xf32> to vector<1x16x32xf32>
    %79 = vector.shape_cast %78 : vector<1x16x32xf32> to vector<16x32xf32>
    %80 = arith.addf %77, %79 : vector<16x32xf32>
    %81 = arith.addf %80, %35 : vector<16x32xf32>
    %82 = arith.addf %24, %81 : vector<16x32xf32>
    %cst_43 = arith.constant dense<0.000000e+00> : vector<16xf32>
    %83 = vector.multi_reduction <add>, %82, %cst_43 [1] : vector<16x32xf32> to vector<16xf32>
    %84 = vector.shape_cast %83 : vector<16xf32> to vector<16x1xf32>
    %cst_44 = arith.constant 3.200000e+01 : f32
    %85 = vector.broadcast %cst_44 : f32 to vector<16x1xf32>
    %86 = arith.divf %84, %85 : vector<16x1xf32>
    %87 = vector.broadcast %86 : vector<16x1xf32> to vector<16x32xf32>
    %88 = arith.subf %82, %87 : vector<16x32xf32>
    %89 = arith.mulf %88, %88 : vector<16x32xf32>
    %cst_45 = arith.constant dense<0.000000e+00> : vector<16xf32>
    %90 = vector.multi_reduction <add>, %89, %cst_45 [1] : vector<16x32xf32> to vector<16xf32>
    %91 = vector.shape_cast %90 : vector<16xf32> to vector<16x1xf32>
    %cst_46 = arith.constant 3.200000e+01 : f32
    %92 = vector.broadcast %cst_46 : f32 to vector<16x1xf32>
    %93 = arith.divf %91, %92 : vector<16x1xf32>
    %94 = vector.broadcast %86 : vector<16x1xf32> to vector<16x32xf32>
    %95 = arith.subf %82, %94 : vector<16x32xf32>
    %cst_47 = arith.constant 9.99999974E-6 : f32
    %96 = vector.broadcast %cst_47 : f32 to vector<16x1xf32>
    %97 = arith.addf %93, %96 : vector<16x1xf32>
    %98 = math.rsqrt %97 : vector<16x1xf32>
    %99 = vector.broadcast %98 : vector<16x1xf32> to vector<16x32xf32>
    %100 = arith.mulf %95, %99 : vector<16x32xf32>
    %101 = arith.mulf %100, %27 : vector<16x32xf32>
    %102 = arith.addf %101, %29 : vector<16x32xf32>
    %c0_48 = arith.constant 0 : index
    %c0_49 = arith.constant 0 : index
    %c0_50 = arith.constant 0 : index
    %103 = vector.load %arg7[%c0_48, %c0_49, %c0_50] : memref<2x32x64xf32, #tpu.memory_space<vmem>>, vector<1x32x64xf32>
    %104 = vector.shape_cast %103 : vector<1x32x64xf32> to vector<32x64xf32>
    %cst_51 = arith.constant dense<0.000000e+00> : vector<16x64xf32>
    %105 = tpu.matmul %102, %104, %cst_51 {dimension_numbers = #tpu.dot_dimension_numbers<[1], [0], [0], [1], [0, 0, 1, 1], [], []>} : vector<16x32xf32>, vector<32x64xf32>, vector<16x64xf32> -> vector<16x64xf32>
    %c0_52 = arith.constant 0 : index
    %c0_53 = arith.constant 0 : index
    %c0_54 = arith.constant 0 : index
    %106 = vector.load %arg4[%c0_52, %c0_53, %c0_54] : memref<2x16x64xf32, #tpu.memory_space<vmem>>, vector<1x16x64xf32>
    %107 = vector.shape_cast %106 : vector<1x16x64xf32> to vector<16x64xf32>
    %108 = arith.addf %105, %107 : vector<16x64xf32>
    %cst_55 = arith.constant 5.000000e-01 : f32
    %109 = vector.broadcast %cst_55 : f32 to vector<16x64xf32>
    %110 = arith.mulf %109, %108 : vector<16x64xf32>
    %cst_56 = arith.constant 0.707106769 : f32
    %111 = vector.broadcast %cst_56 : f32 to vector<16x64xf32>
    %112 = arith.mulf %108, %111 : vector<16x64xf32>
    %113 = math.absf %112 : vector<16x64xf32>
    %cst_57 = arith.constant 0.327591091 : f32
    %114 = vector.broadcast %cst_57 : f32 to vector<16x64xf32>
    %115 = arith.mulf %114, %113 : vector<16x64xf32>
    %cst_58 = arith.constant 1.000000e+00 : f32
    %116 = vector.broadcast %cst_58 : f32 to vector<16x64xf32>
    %117 = arith.addf %116, %115 : vector<16x64xf32>
    %cst_59 = arith.constant 1.000000e+00 : f32
    %118 = vector.broadcast %cst_59 : f32 to vector<16x64xf32>
    %119 = arith.divf %118, %117 : vector<16x64xf32>
    %cst_60 = arith.constant 1.06140542 : f32
    %120 = vector.broadcast %cst_60 : f32 to vector<16x64xf32>
    %121 = arith.mulf %120, %119 : vector<16x64xf32>
    %cst_61 = arith.constant -1.45315206 : f32
    %122 = vector.broadcast %cst_61 : f32 to vector<16x64xf32>
    %123 = arith.addf %121, %122 : vector<16x64xf32>
    %124 = arith.mulf %123, %119 : vector<16x64xf32>
    %cst_62 = arith.constant 1.42141378 : f32
    %125 = vector.broadcast %cst_62 : f32 to vector<16x64xf32>
    %126 = arith.addf %124, %125 : vector<16x64xf32>
    %127 = arith.mulf %126, %119 : vector<16x64xf32>
    %cst_63 = arith.constant -0.284496725 : f32
    %128 = vector.broadcast %cst_63 : f32 to vector<16x64xf32>
    %129 = arith.addf %127, %128 : vector<16x64xf32>
    %130 = arith.mulf %129, %119 : vector<16x64xf32>
    %cst_64 = arith.constant 0.254829586 : f32
    %131 = vector.broadcast %cst_64 : f32 to vector<16x64xf32>
    %132 = arith.addf %130, %131 : vector<16x64xf32>
    %133 = arith.mulf %132, %119 : vector<16x64xf32>
    %cst_65 = arith.constant 0.000000e+00 : f32
    %134 = vector.broadcast %cst_65 : f32 to vector<16x64xf32>
    %135 = arith.subf %134, %113 : vector<16x64xf32>
    %136 = arith.mulf %135, %113 : vector<16x64xf32>
    %137 = math.exp %136 : vector<16x64xf32>
    %138 = arith.mulf %133, %137 : vector<16x64xf32>
    %cst_66 = arith.constant 1.000000e+00 : f32
    %139 = vector.broadcast %cst_66 : f32 to vector<16x64xf32>
    %140 = arith.subf %139, %138 : vector<16x64xf32>
    %cst_67 = arith.constant 0.000000e+00 : f32
    %141 = vector.broadcast %cst_67 : f32 to vector<16x64xf32>
    %142 = arith.cmpf oge, %112, %141 : vector<16x64xf32>
    %cst_68 = arith.constant 0.000000e+00 : f32
    %143 = vector.broadcast %cst_68 : f32 to vector<16x64xf32>
    %144 = arith.subf %143, %140 : vector<16x64xf32>
    %145 = arith.select %142, %140, %144 : vector<16x64xi1>, vector<16x64xf32>
    %cst_69 = arith.constant 1.000000e+00 : f32
    %146 = vector.broadcast %cst_69 : f32 to vector<16x64xf32>
    %147 = arith.addf %146, %145 : vector<16x64xf32>
    %148 = arith.mulf %110, %147 : vector<16x64xf32>
    %c0_70 = arith.constant 0 : index
    %c0_71 = arith.constant 0 : index
    %c0_72 = arith.constant 0 : index
    %149 = vector.load %arg8[%c0_70, %c0_71, %c0_72] : memref<2x64x32xf32, #tpu.memory_space<vmem>>, vector<1x64x32xf32>
    %150 = vector.shape_cast %149 : vector<1x64x32xf32> to vector<64x32xf32>
    %cst_73 = arith.constant dense<0.000000e+00> : vector<16x32xf32>
    %151 = tpu.matmul %148, %150, %cst_73 {dimension_numbers = #tpu.dot_dimension_numbers<[1], [0], [0], [1], [0, 0, 1, 1], [], []>} : vector<16x64xf32>, vector<64x32xf32>, vector<16x32xf32> -> vector<16x32xf32>
    %152 = arith.addf %151, %37 : vector<16x32xf32>
    %153 = arith.addf %102, %152 : vector<16x32xf32>
    %cst_74 = arith.constant dense<0.000000e+00> : vector<16xf32>
    %154 = vector.multi_reduction <add>, %153, %cst_74 [1] : vector<16x32xf32> to vector<16xf32>
    %155 = vector.shape_cast %154 : vector<16xf32> to vector<16x1xf32>
    %cst_75 = arith.constant 3.200000e+01 : f32
    %156 = vector.broadcast %cst_75 : f32 to vector<16x1xf32>
    %157 = arith.divf %155, %156 : vector<16x1xf32>
    %158 = vector.broadcast %157 : vector<16x1xf32> to vector<16x32xf32>
    %159 = arith.subf %153, %158 : vector<16x32xf32>
    %160 = arith.mulf %159, %159 : vector<16x32xf32>
    %cst_76 = arith.constant dense<0.000000e+00> : vector<16xf32>
    %161 = vector.multi_reduction <add>, %160, %cst_76 [1] : vector<16x32xf32> to vector<16xf32>
    %162 = vector.shape_cast %161 : vector<16xf32> to vector<16x1xf32>
    %cst_77 = arith.constant 3.200000e+01 : f32
    %163 = vector.broadcast %cst_77 : f32 to vector<16x1xf32>
    %164 = arith.divf %162, %163 : vector<16x1xf32>
    %165 = vector.broadcast %157 : vector<16x1xf32> to vector<16x32xf32>
    %166 = arith.subf %153, %165 : vector<16x32xf32>
    %cst_78 = arith.constant 9.99999974E-6 : f32
    %167 = vector.broadcast %cst_78 : f32 to vector<16x1xf32>
    %168 = arith.addf %164, %167 : vector<16x1xf32>
    %169 = math.rsqrt %168 : vector<16x1xf32>
    %170 = vector.broadcast %169 : vector<16x1xf32> to vector<16x32xf32>
    %171 = arith.mulf %166, %170 : vector<16x32xf32>
    %172 = arith.mulf %171, %31 : vector<16x32xf32>
    %173 = arith.addf %172, %33 : vector<16x32xf32>
    %c8 = arith.constant 8 : index
    %c0_79 = arith.constant 0 : index
    %c0_80 = arith.constant 0 : index
    %174 = vector.load %arg2[%c8, %c0_79, %c0_80] : memref<14x16x32xf32, #tpu.memory_space<vmem>>, vector<1x16x32xf32>
    %175 = vector.shape_cast %174 : vector<1x16x32xf32> to vector<16x32xf32>
    %c9 = arith.constant 9 : index
    %c0_81 = arith.constant 0 : index
    %c0_82 = arith.constant 0 : index
    %176 = vector.load %arg2[%c9, %c0_81, %c0_82] : memref<14x16x32xf32, #tpu.memory_space<vmem>>, vector<1x16x32xf32>
    %177 = vector.shape_cast %176 : vector<1x16x32xf32> to vector<16x32xf32>
    %c10 = arith.constant 10 : index
    %c0_83 = arith.constant 0 : index
    %c0_84 = arith.constant 0 : index
    %178 = vector.load %arg2[%c10, %c0_83, %c0_84] : memref<14x16x32xf32, #tpu.memory_space<vmem>>, vector<1x16x32xf32>
    %179 = vector.shape_cast %178 : vector<1x16x32xf32> to vector<16x32xf32>
    %c11 = arith.constant 11 : index
    %c0_85 = arith.constant 0 : index
    %c0_86 = arith.constant 0 : index
    %180 = vector.load %arg2[%c11, %c0_85, %c0_86] : memref<14x16x32xf32, #tpu.memory_space<vmem>>, vector<1x16x32xf32>
    %181 = vector.shape_cast %180 : vector<1x16x32xf32> to vector<16x32xf32>
    %c12 = arith.constant 12 : index
    %c0_87 = arith.constant 0 : index
    %c0_88 = arith.constant 0 : index
    %182 = vector.load %arg2[%c12, %c0_87, %c0_88] : memref<14x16x32xf32, #tpu.memory_space<vmem>>, vector<1x16x32xf32>
    %183 = vector.shape_cast %182 : vector<1x16x32xf32> to vector<16x32xf32>
    %c13 = arith.constant 13 : index
    %c0_89 = arith.constant 0 : index
    %c0_90 = arith.constant 0 : index
    %184 = vector.load %arg2[%c13, %c0_89, %c0_90] : memref<14x16x32xf32, #tpu.memory_space<vmem>>, vector<1x16x32xf32>
    %185 = vector.shape_cast %184 : vector<1x16x32xf32> to vector<16x32xf32>
    %186 = vector.shape_cast %173 : vector<16x32xf32> to vector<1x16x32xf32>
    %187 = vector.shape_cast %186 : vector<1x16x32xf32> to vector<1x16x32xf32>
    %188 = vector.broadcast %187 : vector<1x16x32xf32> to vector<12x16x32xf32>
    %c1_91 = arith.constant 1 : index
    %c0_92 = arith.constant 0 : index
    %c0_93 = arith.constant 0 : index
    %c0_94 = arith.constant 0 : index
    %189 = vector.load %arg5[%c1_91, %c0_92, %c0_93, %c0_94] : memref<2x12x32x8xf32, #tpu.memory_space<vmem>>, vector<1x12x32x8xf32>
    %190 = vector.shape_cast %189 : vector<1x12x32x8xf32> to vector<12x32x8xf32>
    "tpu.trace_start"() <{level = 10 : i32, message = "nmh,nhd->nmd"}> : () -> ()
    %cst_95 = arith.constant dense<0.000000e+00> : vector<12x16x8xf32>
    %191 = tpu.matmul %188, %190, %cst_95 {dimension_numbers = #tpu.dot_dimension_numbers<[2], [1], [1], [2], [0, 0, 0, 1, 1, 2], [0], [0]>} : vector<12x16x32xf32>, vector<12x32x8xf32>, vector<12x16x8xf32> -> vector<12x16x8xf32>
    "tpu.trace_stop"() : () -> ()
    %c1_96 = arith.constant 1 : index
    %c0_97 = arith.constant 0 : index
    %c0_98 = arith.constant 0 : index
    %c0_99 = arith.constant 0 : index
    %192 = vector.load %arg3[%c1_96, %c0_97, %c0_98, %c0_99] : memref<2x12x16x8xf32, #tpu.memory_space<vmem>>, vector<1x12x16x8xf32>
    %193 = vector.shape_cast %192 : vector<1x12x16x8xf32> to vector<12x16x8xf32>
    %194 = arith.addf %191, %193 : vector<12x16x8xf32>
    %195 = vector.extract_strided_slice %194 {offsets = [0, 0, 0], sizes = [4, 16, 8], strides = [1, 1, 1]} : vector<12x16x8xf32> to vector<4x16x8xf32>
    %196 = vector.shape_cast %195 : vector<4x16x8xf32> to vector<8x8x8xf32>
    %197 = vector.extract_strided_slice %194 {offsets = [4, 0, 0], sizes = [4, 16, 8], strides = [1, 1, 1]} : vector<12x16x8xf32> to vector<4x16x8xf32>
    %198 = vector.shape_cast %197 : vector<4x16x8xf32> to vector<8x8x8xf32>
    %199 = vector.extract_strided_slice %194 {offsets = [8, 0, 0], sizes = [4, 16, 8], strides = [1, 1, 1]} : vector<12x16x8xf32> to vector<4x16x8xf32>
    %200 = vector.shape_cast %199 : vector<4x16x8xf32> to vector<8x8x8xf32>
    "tpu.trace_start"() <{level = 10 : i32, message = "gqd,gkd->gqk"}> : () -> ()
    %cst_100 = arith.constant dense<0.000000e+00> : vector<8x8x8xf32>
    %201 = tpu.matmul %196, %198, %cst_100 {dimension_numbers = #tpu.dot_dimension_numbers<[2], [2], [1], [1], [0, 0, 0, 1, 1, 1], [0], [0]>} : vector<8x8x8xf32>, vector<8x8x8xf32>, vector<8x8x8xf32> -> vector<8x8x8xf32>
    "tpu.trace_stop"() : () -> ()
    %202 = arith.addf %201, %25 : vector<8x8x8xf32>
    %cst_101 = arith.constant dense<0xFF800000> : vector<8x8xf32>
    %203 = vector.multi_reduction <maximumf>, %202, %cst_101 [2] : vector<8x8x8xf32> to vector<8x8xf32>
    %204 = vector.shape_cast %203 : vector<8x8xf32> to vector<8x8x1xf32>
    %205 = vector.broadcast %204 : vector<8x8x1xf32> to vector<8x8x8xf32>
    %206 = arith.subf %202, %205 : vector<8x8x8xf32>
    %207 = math.exp %206 : vector<8x8x8xf32>
    %cst_102 = arith.constant dense<0.000000e+00> : vector<8x8xf32>
    %208 = vector.multi_reduction <add>, %207, %cst_102 [2] : vector<8x8x8xf32> to vector<8x8xf32>
    %209 = vector.shape_cast %208 : vector<8x8xf32> to vector<8x8x1xf32>
    %210 = tpu.reciprocal %209 {approx = true} : vector<8x8x1xf32> -> vector<8x8x1xf32>
    %211 = vector.broadcast %210 : vector<8x8x1xf32> to vector<8x8x8xf32>
    %212 = arith.mulf %207, %211 : vector<8x8x8xf32>
    "tpu.trace_start"() <{level = 10 : i32, message = "gqk,gkd->gqd"}> : () -> ()
    %cst_103 = arith.constant dense<0.000000e+00> : vector<8x8x8xf32>
    %213 = tpu.matmul %212, %200, %cst_103 {dimension_numbers = #tpu.dot_dimension_numbers<[2], [1], [1], [2], [0, 0, 0, 1, 1, 2], [0], [0]>} : vector<8x8x8xf32>, vector<8x8x8xf32>, vector<8x8x8xf32> -> vector<8x8x8xf32>
    "tpu.trace_stop"() : () -> ()
    %214 = vector.shape_cast %213 : vector<8x8x8xf32> to vector<4x16x8xf32>
    %c1_104 = arith.constant 1 : index
    %c0_105 = arith.constant 0 : index
    %c0_106 = arith.constant 0 : index
    %c0_107 = arith.constant 0 : index
    %215 = vector.load %arg6[%c1_104, %c0_105, %c0_106, %c0_107] : memref<2x4x8x32xf32, #tpu.memory_space<vmem>>, vector<1x4x8x32xf32>
    %216 = vector.shape_cast %215 : vector<1x4x8x32xf32> to vector<4x8x32xf32>
    "tpu.trace_start"() <{level = 10 : i32, message = "nmd,ndh->nmh"}> : () -> ()
    %cst_108 = arith.constant dense<0.000000e+00> : vector<4x16x32xf32>
    %217 = tpu.matmul %214, %216, %cst_108 {dimension_numbers = #tpu.dot_dimension_numbers<[2], [1], [1], [2], [0, 0, 0, 1, 1, 2], [0], [0]>} : vector<4x16x8xf32>, vector<4x8x32xf32>, vector<4x16x32xf32> -> vector<4x16x32xf32>
    "tpu.trace_stop"() : () -> ()
    %218 = vector.extract_strided_slice %217 {offsets = [0, 0, 0], sizes = [1, 16, 32], strides = [1, 1, 1]} : vector<4x16x32xf32> to vector<1x16x32xf32>
    %219 = vector.shape_cast %218 : vector<1x16x32xf32> to vector<16x32xf32>
    %220 = vector.extract_strided_slice %217 {offsets = [1, 0, 0], sizes = [1, 16, 32], strides = [1, 1, 1]} : vector<4x16x32xf32> to vector<1x16x32xf32>
    %221 = vector.shape_cast %220 : vector<1x16x32xf32> to vector<16x32xf32>
    %222 = arith.addf %219, %221 : vector<16x32xf32>
    %223 = vector.extract_strided_slice %217 {offsets = [2, 0, 0], sizes = [1, 16, 32], strides = [1, 1, 1]} : vector<4x16x32xf32> to vector<1x16x32xf32>
    %224 = vector.shape_cast %223 : vector<1x16x32xf32> to vector<16x32xf32>
    %225 = arith.addf %222, %224 : vector<16x32xf32>
    %226 = vector.extract_strided_slice %217 {offsets = [3, 0, 0], sizes = [1, 16, 32], strides = [1, 1, 1]} : vector<4x16x32xf32> to vector<1x16x32xf32>
    %227 = vector.shape_cast %226 : vector<1x16x32xf32> to vector<16x32xf32>
    %228 = arith.addf %225, %227 : vector<16x32xf32>
    %229 = arith.addf %228, %183 : vector<16x32xf32>
    %230 = arith.addf %173, %229 : vector<16x32xf32>
    %cst_109 = arith.constant dense<0.000000e+00> : vector<16xf32>
    %231 = vector.multi_reduction <add>, %230, %cst_109 [1] : vector<16x32xf32> to vector<16xf32>
    %232 = vector.shape_cast %231 : vector<16xf32> to vector<16x1xf32>
    %cst_110 = arith.constant 3.200000e+01 : f32
    %233 = vector.broadcast %cst_110 : f32 to vector<16x1xf32>
    %234 = arith.divf %232, %233 : vector<16x1xf32>
    %235 = vector.broadcast %234 : vector<16x1xf32> to vector<16x32xf32>
    %236 = arith.subf %230, %235 : vector<16x32xf32>
    %237 = arith.mulf %236, %236 : vector<16x32xf32>
    %cst_111 = arith.constant dense<0.000000e+00> : vector<16xf32>
    %238 = vector.multi_reduction <add>, %237, %cst_111 [1] : vector<16x32xf32> to vector<16xf32>
    %239 = vector.shape_cast %238 : vector<16xf32> to vector<16x1xf32>
    %cst_112 = arith.constant 3.200000e+01 : f32
    %240 = vector.broadcast %cst_112 : f32 to vector<16x1xf32>
    %241 = arith.divf %239, %240 : vector<16x1xf32>
    %242 = vector.broadcast %234 : vector<16x1xf32> to vector<16x32xf32>
    %243 = arith.subf %230, %242 : vector<16x32xf32>
    %cst_113 = arith.constant 9.99999974E-6 : f32
    %244 = vector.broadcast %cst_113 : f32 to vector<16x1xf32>
    %245 = arith.addf %241, %244 : vector<16x1xf32>
    %246 = math.rsqrt %245 : vector<16x1xf32>
    %247 = vector.broadcast %246 : vector<16x1xf32> to vector<16x32xf32>
    %248 = arith.mulf %243, %247 : vector<16x32xf32>
    %249 = arith.mulf %248, %175 : vector<16x32xf32>
    %250 = arith.addf %249, %177 : vector<16x32xf32>
    %c1_114 = arith.constant 1 : index
    %c0_115 = arith.constant 0 : index
    %c0_116 = arith.constant 0 : index
    %251 = vector.load %arg7[%c1_114, %c0_115, %c0_116] : memref<2x32x64xf32, #tpu.memory_space<vmem>>, vector<1x32x64xf32>
    %252 = vector.shape_cast %251 : vector<1x32x64xf32> to vector<32x64xf32>
    %cst_117 = arith.constant dense<0.000000e+00> : vector<16x64xf32>
    %253 = tpu.matmul %250, %252, %cst_117 {dimension_numbers = #tpu.dot_dimension_numbers<[1], [0], [0], [1], [0, 0, 1, 1], [], []>} : vector<16x32xf32>, vector<32x64xf32>, vector<16x64xf32> -> vector<16x64xf32>
    %c1_118 = arith.constant 1 : index
    %c0_119 = arith.constant 0 : index
    %c0_120 = arith.constant 0 : index
    %254 = vector.load %arg4[%c1_118, %c0_119, %c0_120] : memref<2x16x64xf32, #tpu.memory_space<vmem>>, vector<1x16x64xf32>
    %255 = vector.shape_cast %254 : vector<1x16x64xf32> to vector<16x64xf32>
    %256 = arith.addf %253, %255 : vector<16x64xf32>
    %cst_121 = arith.constant 5.000000e-01 : f32
    %257 = vector.broadcast %cst_121 : f32 to vector<16x64xf32>
    %258 = arith.mulf %257, %256 : vector<16x64xf32>
    %cst_122 = arith.constant 0.707106769 : f32
    %259 = vector.broadcast %cst_122 : f32 to vector<16x64xf32>
    %260 = arith.mulf %256, %259 : vector<16x64xf32>
    %261 = math.absf %260 : vector<16x64xf32>
    %cst_123 = arith.constant 0.327591091 : f32
    %262 = vector.broadcast %cst_123 : f32 to vector<16x64xf32>
    %263 = arith.mulf %262, %261 : vector<16x64xf32>
    %cst_124 = arith.constant 1.000000e+00 : f32
    %264 = vector.broadcast %cst_124 : f32 to vector<16x64xf32>
    %265 = arith.addf %264, %263 : vector<16x64xf32>
    %cst_125 = arith.constant 1.000000e+00 : f32
    %266 = vector.broadcast %cst_125 : f32 to vector<16x64xf32>
    %267 = arith.divf %266, %265 : vector<16x64xf32>
    %cst_126 = arith.constant 1.06140542 : f32
    %268 = vector.broadcast %cst_126 : f32 to vector<16x64xf32>
    %269 = arith.mulf %268, %267 : vector<16x64xf32>
    %cst_127 = arith.constant -1.45315206 : f32
    %270 = vector.broadcast %cst_127 : f32 to vector<16x64xf32>
    %271 = arith.addf %269, %270 : vector<16x64xf32>
    %272 = arith.mulf %271, %267 : vector<16x64xf32>
    %cst_128 = arith.constant 1.42141378 : f32
    %273 = vector.broadcast %cst_128 : f32 to vector<16x64xf32>
    %274 = arith.addf %272, %273 : vector<16x64xf32>
    %275 = arith.mulf %274, %267 : vector<16x64xf32>
    %cst_129 = arith.constant -0.284496725 : f32
    %276 = vector.broadcast %cst_129 : f32 to vector<16x64xf32>
    %277 = arith.addf %275, %276 : vector<16x64xf32>
    %278 = arith.mulf %277, %267 : vector<16x64xf32>
    %cst_130 = arith.constant 0.254829586 : f32
    %279 = vector.broadcast %cst_130 : f32 to vector<16x64xf32>
    %280 = arith.addf %278, %279 : vector<16x64xf32>
    %281 = arith.mulf %280, %267 : vector<16x64xf32>
    %cst_131 = arith.constant 0.000000e+00 : f32
    %282 = vector.broadcast %cst_131 : f32 to vector<16x64xf32>
    %283 = arith.subf %282, %261 : vector<16x64xf32>
    %284 = arith.mulf %283, %261 : vector<16x64xf32>
    %285 = math.exp %284 : vector<16x64xf32>
    %286 = arith.mulf %281, %285 : vector<16x64xf32>
    %cst_132 = arith.constant 1.000000e+00 : f32
    %287 = vector.broadcast %cst_132 : f32 to vector<16x64xf32>
    %288 = arith.subf %287, %286 : vector<16x64xf32>
    %cst_133 = arith.constant 0.000000e+00 : f32
    %289 = vector.broadcast %cst_133 : f32 to vector<16x64xf32>
    %290 = arith.cmpf oge, %260, %289 : vector<16x64xf32>
    %cst_134 = arith.constant 0.000000e+00 : f32
    %291 = vector.broadcast %cst_134 : f32 to vector<16x64xf32>
    %292 = arith.subf %291, %288 : vector<16x64xf32>
    %293 = arith.select %290, %288, %292 : vector<16x64xi1>, vector<16x64xf32>
    %cst_135 = arith.constant 1.000000e+00 : f32
    %294 = vector.broadcast %cst_135 : f32 to vector<16x64xf32>
    %295 = arith.addf %294, %293 : vector<16x64xf32>
    %296 = arith.mulf %258, %295 : vector<16x64xf32>
    %c1_136 = arith.constant 1 : index
    %c0_137 = arith.constant 0 : index
    %c0_138 = arith.constant 0 : index
    %297 = vector.load %arg8[%c1_136, %c0_137, %c0_138] : memref<2x64x32xf32, #tpu.memory_space<vmem>>, vector<1x64x32xf32>
    %298 = vector.shape_cast %297 : vector<1x64x32xf32> to vector<64x32xf32>
    %cst_139 = arith.constant dense<0.000000e+00> : vector<16x32xf32>
    %299 = tpu.matmul %296, %298, %cst_139 {dimension_numbers = #tpu.dot_dimension_numbers<[1], [0], [0], [1], [0, 0, 1, 1], [], []>} : vector<16x64xf32>, vector<64x32xf32>, vector<16x32xf32> -> vector<16x32xf32>
    %300 = arith.addf %299, %185 : vector<16x32xf32>
    %301 = arith.addf %250, %300 : vector<16x32xf32>
    %cst_140 = arith.constant dense<0.000000e+00> : vector<16xf32>
    %302 = vector.multi_reduction <add>, %301, %cst_140 [1] : vector<16x32xf32> to vector<16xf32>
    %303 = vector.shape_cast %302 : vector<16xf32> to vector<16x1xf32>
    %cst_141 = arith.constant 3.200000e+01 : f32
    %304 = vector.broadcast %cst_141 : f32 to vector<16x1xf32>
    %305 = arith.divf %303, %304 : vector<16x1xf32>
    %306 = vector.broadcast %305 : vector<16x1xf32> to vector<16x32xf32>
    %307 = arith.subf %301, %306 : vector<16x32xf32>
    %308 = arith.mulf %307, %307 : vector<16x32xf32>
    %cst_142 = arith.constant dense<0.000000e+00> : vector<16xf32>
    %309 = vector.multi_reduction <add>, %308, %cst_142 [1] : vector<16x32xf32> to vector<16xf32>
    %310 = vector.shape_cast %309 : vector<16xf32> to vector<16x1xf32>
    %cst_143 = arith.constant 3.200000e+01 : f32
    %311 = vector.broadcast %cst_143 : f32 to vector<16x1xf32>
    %312 = arith.divf %310, %311 : vector<16x1xf32>
    %313 = vector.broadcast %305 : vector<16x1xf32> to vector<16x32xf32>
    %314 = arith.subf %301, %313 : vector<16x32xf32>
    %cst_144 = arith.constant 9.99999974E-6 : f32
    %315 = vector.broadcast %cst_144 : f32 to vector<16x1xf32>
    %316 = arith.addf %312, %315 : vector<16x1xf32>
    %317 = math.rsqrt %316 : vector<16x1xf32>
    %318 = vector.broadcast %317 : vector<16x1xf32> to vector<16x32xf32>
    %319 = arith.mulf %314, %318 : vector<16x32xf32>
    %320 = arith.mulf %319, %179 : vector<16x32xf32>
    %321 = arith.addf %320, %181 : vector<16x32xf32>
    %322 = vector.extract_strided_slice %321 {offsets = [0, 0], sizes = [1, 32], strides = [1, 1]} : vector<16x32xf32> to vector<1x32xf32>
    %323 = vector.extract_strided_slice %321 {offsets = [8, 0], sizes = [1, 32], strides = [1, 1]} : vector<16x32xf32> to vector<1x32xf32>
    %324 = tpu.concatenate %322, %323 in 0 : vector<1x32xf32>, vector<1x32xf32> -> vector<2x32xf32>
    %c0_145 = arith.constant 0 : index
    %c0_146 = arith.constant 0 : index
    %325 = vector.load %arg9[%c0_145, %c0_146] : memref<40x128xf32, #tpu.memory_space<vmem>>, vector<32x128xf32>
    %cst_147 = arith.constant dense<0.000000e+00> : vector<2x128xf32>
    %326 = tpu.matmul %324, %325, %cst_147 {dimension_numbers = #tpu.dot_dimension_numbers<[1], [0], [0], [1], [0, 0, 1, 1], [], []>} : vector<2x32xf32>, vector<32x128xf32>, vector<2x128xf32> -> vector<2x128xf32>
    %c32 = arith.constant 32 : index
    %c0_148 = arith.constant 0 : index
    %327 = vector.load %arg9[%c32, %c0_148] : memref<40x128xf32, #tpu.memory_space<vmem>>, vector<2x128xf32>
    %328 = arith.addf %326, %327 : vector<2x128xf32>
    %c0_149 = arith.constant 0 : index
    %c0_150 = arith.constant 0 : index
    %329 = vector.load %arg10[%c0_149, %c0_150] : memref<2x128xf32, #tpu.memory_space<vmem>>, vector<2x128xf32>
    tpu.vector_store %arg10[%c0_149, %c0_150], %328 {strides = array<i32>} : memref<2x128xf32, #tpu.memory_space<vmem>>, vector<2x128xf32>,
    return
  }
}

</mosaic_0001>

<bundles_post_ra>
// kernel: xlmr_classifier_forward.1
= control target key start
LH: loop header
LB: loop body
LE: loop exit
PB: predicated region body
PF: predicated region fallthrough
CT: control target
= control target key end

     0   :  { %vm43_vm0 = vcmask 261120   ;;  %s8346_s0 = inlined_call_operand.vmem [shape: f32[16,32], index: 0, kind: input, shape index: {}]   ;;  %s8347_s1 = inlined_call_operand.vmem [shape: f32[8,8,8], index: 1, kind: input, shape index: {}]   ;;  %s8348_s2 = inlined_call_operand.vmem [shape: f32[14,16,32], index: 2, kind: input, shape index: {}]   ;;  %s8349_s3 = inlined_call_operand.vmem [shape: f32[2,12,16,8], index: 3, kind: input, shape index: {}]   ;;  %s8350_s4 = inlined_call_operand.vmem [shape: f32[2,16,64], index: 4, kind: input, shape index: {}]   ;;  %s8351_s5 = inlined_call_operand.vmem [shape: f32[2,12,32,8], index: 5, kind: input, shape index: {}]   ;;  %s8352_s6 = inlined_call_operand.vmem [shape: f32[2,4,8,32], index: 6, kind: input, shape index: {}]   ;;  %s8353_s7 = inlined_call_operand.vmem [shape: f32[2,32,64], index: 7, kind: input, shape index: {}]   ;;  %s8354_s8 = inlined_call_operand.vmem [shape: f32[2,64,32], index: 8, kind: input, shape index: {}]   ;;  %s8355_s9 = inlined_call_operand.vmem [shape: f32[40,128], index: 9, kind: input, shape index: {}]   ;;  %s8356_s10 = inlined_call_operand.hbm [shape: f32[2,128], index: 10, kind: output, shape index: {}]  }
   0x1   :  { %v36_v0 = vld [vmem:[%s8346_s0] sm:$0xff]  ;;  %v37_v1 = vld [vmem:[%s8346_s0 + $0x8] sm:$0xff] }
   0x2   :  { %15 = vsyncpa [#allocation3], 0  ;;  %v44_v2 = vsel %vm43_vm0, %v36_v0, 0.0  ;;  %v47_v3 = vsel %vm43_vm0, %v37_v1, 0.0  ;;  %v104_v14 = vld [vmem:[%s8351_s5 + $0x18] sm:$0xff]  ;;  %v103_v16 = vld [vmem:[%s8351_s5 + $0x10] sm:$0xff] }
   0x3   :  { %45 = vadd.xlane.f32.xlu0 %v44_v2  ;;  %v108_v15 = vld [vmem:[%s8351_s5 + $0x38] sm:$0xff]  ;;  %6507 = vmatprep.subr.mxu0 %v104_v14  ;;  %v107_v17 = vld [vmem:[%s8351_s5 + $0x30] sm:$0xff]  ;;  %v102_v18 = vld [vmem:[%s8351_s5 + $0x8] sm:$0xff]  ;;  %vm7176_vm1 = vmmov 0   ;;  %vm1079_vm2 = vcmask 64512   ;;  %vm2877_vm5 = vcmask 523264  }
   0x4   :  { %6518 = vmatprep.subr.mxu1 %v108_v15  ;;  %6508 = vmatpush3.msra.mxu0 %v104_v14  ;;  %v106_v19 = vld [vmem:[%s8351_s5 + $0x28] sm:$0xff]  ;;  %v101_v20 = vld [vmem:[%s8351_s5] sm:$0xff]  ;;  %v112_v22 = vld [vmem:[%s8351_s5 + $0x58] sm:$0xff]  ;;  %vm5906_vm8 = vcmask 1040384   ;;  %s7177_s14 = smov [#allocation2]  }
   0x5   :  { %6519 = vmatpush3.msra.mxu1 %v108_v15  ;;  %6509 = vmatprep.subr.mxu0 %v103_v16  ;;  %v105_v21 = vld [vmem:[%s8351_s5 + $0x20] sm:$0xff]  ;;  %v116_v23 = vld [vmem:[%s8351_s5 + $0x78] sm:$0xff]  ;;  %v6001_v33 = vld [vmem:[%s8348_s2 + $0x10] sm:$0xff]  ;;  %s5993_s15 = sshll.u32 %s7177_s14, 4  ;;  %s5994_s15 = int_to_ptr.vmem [resolvable:$true] %s5993_s15 }
   0x6   :  { %6520 = vmatprep.subr.mxu1 %v107_v17  ;;  %6510 = vmatpush3.msra.mxu0 %v103_v16  ;;  %v38_v31 = vld [vmem:[%s8348_s2] sm:$0xff]  ;;  %v39_v36 = vld [vmem:[%s8348_s2 + $0x8] sm:$0xff]  ;;  %v6002_v39 = vld [vmem:[%s8348_s2 + $0x18] sm:$0xff]  ;;  %v7175_v16 = vmov 0.0   ;;  %p7158_p1 = scmp.lt.s32.totalorder %s5994_s15, %s5994_s15 }
   0x7   :  { %48 = vadd.xlane.f32.xlu0 %v47_v3  ;;  %6521 = vmatpush3.msra.mxu1 %v107_v17  ;;  %v111_v42 = vld [vmem:[%s8351_s5 + $0x50] sm:$0xff]  ;;  %v110_v44 = vld [vmem:[%s8351_s5 + $0x48] sm:$0xff]  ;;  %v109_v46 = vld [vmem:[%s8351_s5 + $0x40] sm:$0xff] }
   0x8   :  { %6511 = vmatprep.subr.mxu0 %v102_v18  ;;  %6522 = vmatprep.subr.mxu1 %v106_v19  ;;  %v115_v43 = vld [vmem:[%s8351_s5 + $0x70] sm:$0xff]  ;;  %v114_v45 = vld [vmem:[%s8351_s5 + $0x68] sm:$0xff]  ;;  %v113_v47 = vld [vmem:[%s8351_s5 + $0x60] sm:$0xff] }
   0x9   :  { %6512 = vmatpush3.msra.mxu0 %v102_v18  ;;  %6523 = vmatpush3.msra.mxu1 %v106_v19  ;;  %v120_v48 = vld [vmem:[%s8351_s5 + $0x98] sm:$0xff]  ;;  %v119_v50 = vld [vmem:[%s8351_s5 + $0x90] sm:$0xff]  ;;  %v118_v52 = vld [vmem:[%s8351_s5 + $0x88] sm:$0xff] }
   0xa   :  { %6513 = vmatprep.subr.mxu0 %v101_v20  ;;  %6524 = vmatprep.subr.mxu1 %v105_v21  ;;  %v124_v49 = vld [vmem:[%s8351_s5 + $0xb8] sm:$0xff]  ;;  %v123_v51 = vld [vmem:[%s8351_s5 + $0xb0] sm:$0xff]  ;;  %v122_v53 = vld [vmem:[%s8351_s5 + $0xa8] sm:$0xff] }
   0xb   :  { %6514 = vmatpush3.msra.mxu0 %v101_v20  ;;  %6525 = vmatpush3.msra.mxu1 %v105_v21  ;;  %v117_v54 = vld [vmem:[%s8351_s5 + $0x80] sm:$0xff]  ;;  %v128_v56 = vld [vmem:[%s8351_s5 + $0xd8] sm:$0xff]  ;;  %v127_v58 = vld [vmem:[%s8351_s5 + $0xd0] sm:$0xff] }
   0xc   :  { %6529 = vmatprep.subr.mxu0 %v112_v22  ;;  %6540 = vmatprep.subr.mxu1 %v116_v23  ;;  %v121_v55 = vld [vmem:[%s8351_s5 + $0xa0] sm:$0xff]  ;;  %v132_v57 = vld [vmem:[%s8351_s5 + $0xf8] sm:$0xff]  ;;  %v131_v59 = vld [vmem:[%s8351_s5 + $0xf0] sm:$0xff] }
   0xd   :  { %v126_v60 = vld [vmem:[%s8351_s5 + $0xc8] sm:$0xff]  ;;  %v125_v62 = vld [vmem:[%s8351_s5 + $0xc0] sm:$0xff]  ;;  %v135_v2 = vld [vmem:[%s8351_s5 + $0x110] sm:$0xff] }
   0xe   :  { %v130_v61 = vld [vmem:[%s8351_s5 + $0xe8] sm:$0xff]  ;;  %v129_v63 = vld [vmem:[%s8351_s5 + $0xe0] sm:$0xff]  ;;  %v139_v3 = vld [vmem:[%s8351_s5 + $0x130] sm:$0xff] }
   0xf   :  { %v141_v14 = vld [vmem:[%s8351_s5 + $0x140] sm:$0xff] }
  0x10   :  { %v145_v15 = vld [vmem:[%s8351_s5 + $0x160] sm:$0xff] }
  0x8c   :  { %v46_v4 = vpop.xlane.xlu0 %45 }
  0x8d   :  { %v51_v5 = vmul.f32 0.03125, %v46_v4  ;;  %v134_v4 = vld [vmem:[%s8351_s5 + $0x108] sm:$0xff] }
  0x8f   :  { %v53_v6 = vsub.f32 %v36_v0, %v51_v5  ;;  %v136_v0 = vld [vmem:[%s8351_s5 + $0x118] sm:$0xff]  ;;  %v138_v5 = vld [vmem:[%s8351_s5 + $0x128] sm:$0xff] }
  0x90   :  { %v49_v7 = vpop.xlane.xlu0 %48 }
  0x91   :  { %v52_v8 = vmul.f32 0.03125, %v49_v7  ;;  %v55_v9 = vmul.f32 %v53_v6, %v53_v6  ;;  %v137_v7 = vld [vmem:[%s8351_s5 + $0x120] sm:$0xff] }
  0x93   :  { %v54_v10 = vsub.f32 %v37_v1, %v52_v8  ;;  %v57_v11 = vsel %vm43_vm0, %v55_v9, 0.0  ;;  %v140_v1 = vld [vmem:[%s8351_s5 + $0x138] sm:$0xff] }
  0x94   :  { %58 = vadd.xlane.f32.xlu1 %v57_v11  ;;  %v144_v8 = vld [vmem:[%s8351_s5 + $0x158] sm:$0xff]  ;;  %v147_v11 = vld [vmem:[%s8351_s5 + $0x170] sm:$0xff] }
  0x95   :  { %v56_v12 = vmul.f32 %v54_v10, %v54_v10  ;;  %v148_v9 = vld [vmem:[%s8351_s5 + $0x178] sm:$0xff] }
  0x97   :  { %v60_v13 = vsel %vm43_vm0, %v56_v12, 0.0  ;;  %v142_v12 = vld [vmem:[%s8351_s5 + $0x148] sm:$0xff] }
  0x98   :  { %61 = vadd.xlane.f32.xlu1 %v60_v13  ;;  %v146_v13 = vld [vmem:[%s8351_s5 + $0x168] sm:$0xff] }
 0x11d   :  { %v59_v24 = vpop.xlane.xlu1 %58 }
 0x11e   :  { %v63_v25 = vmul.f32 0.03125, %v59_v24 }
 0x120   :  { %v65_v26 = vadd.f32 1e-05, %v63_v25  ;;  %v158_v25 = vld [vmem:[%s8349_s3 + $0x48] sm:$0xff] }
 0x121   :  { %v62_v27 = vpop.xlane.xlu1 %61 }
 0x122   :  { %7045 = vrsqrt.f32 %v65_v26  ;;  %v64_v28 = vmul.f32 0.03125, %v62_v27 }
 0x124   :  { %v66_v29 = vadd.f32 1e-05, %v64_v28  ;;  %v157_v28 = vld [vmem:[%s8349_s3 + $0x40] sm:$0xff] }
 0x126   :  { %7047 = vrsqrt.f32 %v66_v29  ;;  %v150_v29 = vld [vmem:[%s8349_s3 + $0x8] sm:$0xff] }
 0x12f   :  { %v7046_v30 = vpop.eup %7045 }
 0x130   :  { %v69_v32 = vmul.f32 %v7046_v30, %v53_v6  ;;  %v133_v6 = vld [vmem:[%s8351_s5 + $0x100] sm:$0xff] }
 0x132   :  { %v71_v34 = vmul.f32 %v69_v32, %v38_v31  ;;  %v160_v31 = vld [vmem:[%s8349_s3 + $0x58] sm:$0xff] }
 0x133   :  { %v7048_v35 = vpop.eup %7047 }
 0x134   :  { %v7282_v37 = vadd.f32 %v6001_v33, %v71_v34  ;;  %v70_v38 = vmul.f32 %v7048_v35, %v54_v10  ;;  %v143_v10 = vld [vmem:[%s8351_s5 + $0x150] sm:$0xff]  ;;  %v149_v33 = vld [vmem:[%s8349_s3] sm:$0xff] }
 0x136   :  { %v72_v40 = vmul.f32 %v70_v38, %v39_v36  ;;  %6515 = vmatprep.mubr.msk.f32.mxu0 %vm43_vm0, %v7282_v37  ;;  %6526 = vmatprep.mubr.msk.f32.mxu1 %vm43_vm0, %v7282_v37  ;;  %v159_v38 = vld [vmem:[%s8349_s3 + $0x50] sm:$0xff] }
 0x138   :  { %v7291_v41 = vadd.f32 %v6002_v39, %v72_v40  ;;  %v152_v39 = vld [vmem:[%s8349_s3 + $0x18] sm:$0xff] }
 0x13a   :  { %6516 = vmatmul.mubr.msk.f32.vlgmr.msra.gmra.mxu0 %vm43_vm0, %v7291_v41  ;;  %6527 = vmatmul.mubr.msk.f32.vlgmr.msra.gmra.mxu1 %vm43_vm0, %v7291_v41 }
 0x13b   :  { %6530 = vmatpush3.msra.mxu0 %v112_v22  ;;  %6541 = vmatpush3.msra.mxu1 %v116_v23 }
 0x13c   :  { %6531 = vmatprep.subr.mxu0 %v111_v42  ;;  %6537 = vmatprep.mubr.msk.f32.mxu0 %vm43_vm0, %v7282_v37 }
 0x13d   :  { %6542 = vmatprep.subr.mxu1 %v115_v43  ;;  %6548 = vmatprep.mubr.msk.f32.mxu1 %vm43_vm0, %v7282_v37 }
 0x13e   :  { %6532 = vmatpush3.msra.mxu0 %v111_v42  ;;  %6543 = vmatpush3.msra.mxu1 %v115_v43  ;;  %v151_v43 = vld [vmem:[%s8349_s3 + $0x10] sm:$0xff] }
 0x13f   :  { %6533 = vmatprep.subr.mxu0 %v110_v44  ;;  %6544 = vmatprep.subr.mxu1 %v114_v45 }
 0x140   :  { %6534 = vmatpush3.msra.mxu0 %v110_v44  ;;  %6545 = vmatpush3.msra.mxu1 %v114_v45 }
 0x141   :  { %6535 = vmatprep.subr.mxu0 %v109_v46  ;;  %6546 = vmatprep.subr.mxu1 %v113_v47 }
 0x142   :  { %6536 = vmatpush3.msra.mxu0 %v109_v46  ;;  %6547 = vmatpush3.msra.mxu1 %v113_v47  ;;  %v162_v46 = vld [vmem:[%s8349_s3 + $0x68] sm:$0xff] }
 0x143   :  { %6538 = vmatmul.mubr.msk.f32.vlgmr.msra.gmra.mxu0 %vm43_vm0, %v7291_v41  ;;  %6549 = vmatmul.mubr.msk.f32.vlgmr.msra.gmra.mxu1 %vm43_vm0, %v7291_v41 }
 0x144   :  { %6551 = vmatprep.subr.mxu0 %v120_v48  ;;  %6562 = vmatprep.subr.mxu1 %v124_v49 }
 0x145   :  { %6552 = vmatpush3.msra.mxu0 %v120_v48  ;;  %6559 = vmatprep.mubr.msk.f32.mxu0 %vm43_vm0, %v7282_v37 }
 0x146   :  { %6563 = vmatpush3.msra.mxu1 %v124_v49  ;;  %6570 = vmatprep.mubr.msk.f32.mxu1 %vm43_vm0, %v7282_v37 }
 0x147   :  { %6553 = vmatprep.subr.mxu0 %v119_v50  ;;  %6564 = vmatprep.subr.mxu1 %v123_v51 }
 0x148   :  { %6554 = vmatpush3.msra.mxu0 %v119_v50  ;;  %6565 = vmatpush3.msra.mxu1 %v123_v51  ;;  %v161_v50 = vld [vmem:[%s8349_s3 + $0x60] sm:$0xff]  ;;  %v154_v51 = vld [vmem:[%s8349_s3 + $0x28] sm:$0xff] }
 0x149   :  { %6555 = vmatprep.subr.mxu0 %v118_v52  ;;  %6566 = vmatprep.subr.mxu1 %v122_v53 }
 0x14a   :  { %6556 = vmatpush3.msra.mxu0 %v118_v52  ;;  %6567 = vmatpush3.msra.mxu1 %v122_v53  ;;  %v164_v53 = vld [vmem:[%s8349_s3 + $0x78] sm:$0xff] }
 0x14b   :  { %6557 = vmatprep.subr.mxu0 %v117_v54  ;;  %6568 = vmatprep.subr.mxu1 %v121_v55 }
 0x14c   :  { %6558 = vmatpush3.msra.mxu0 %v117_v54  ;;  %6569 = vmatpush3.msra.mxu1 %v121_v55  ;;  %v153_v55 = vld [vmem:[%s8349_s3 + $0x20] sm:$0xff] }
 0x14d   :  { %6560 = vmatmul.mubr.msk.f32.vlgmr.msra.gmra.mxu0 %vm43_vm0, %v7291_v41  ;;  %6571 = vmatmul.mubr.msk.f32.vlgmr.msra.gmra.mxu1 %vm43_vm0, %v7291_v41 }
 0x14e   :  { %6573 = vmatprep.subr.mxu0 %v128_v56  ;;  %6584 = vmatprep.subr.mxu1 %v132_v57 }
 0x14f   :  { %6574 = vmatpush3.msra.mxu0 %v128_v56  ;;  %6581 = vmatprep.mubr.msk.f32.mxu0 %vm43_vm0, %v7282_v37 }
 0x150   :  { %6585 = vmatpush3.msra.mxu1 %v132_v57  ;;  %6592 = vmatprep.mubr.msk.f32.mxu1 %vm43_vm0, %v7282_v37 }
 0x151   :  { %6575 = vmatprep.subr.mxu0 %v127_v58  ;;  %6586 = vmatprep.subr.mxu1 %v131_v59 }
 0x152   :  { %6576 = vmatpush3.msra.mxu0 %v127_v58  ;;  %6587 = vmatpush3.msra.mxu1 %v131_v59  ;;  %v163_v59 = vld [vmem:[%s8349_s3 + $0x70] sm:$0xff] }
 0x153   :  { %6577 = vmatprep.subr.mxu0 %v126_v60  ;;  %6588 = vmatprep.subr.mxu1 %v130_v61 }
 0x154   :  { %6578 = vmatpush3.msra.mxu0 %v126_v60  ;;  %6589 = vmatpush3.msra.mxu1 %v130_v61  ;;  %v156_v60 = vld [vmem:[%s8349_s3 + $0x38] sm:$0xff] }
 0x155   :  { %6579 = vmatprep.subr.mxu0 %v125_v62  ;;  %6590 = vmatprep.subr.mxu1 %v129_v63 }
 0x156   :  { %6580 = vmatpush3.msra.mxu0 %v125_v62  ;;  %6591 = vmatpush3.msra.mxu1 %v129_v63  ;;  %v155_v63 = vld [vmem:[%s8349_s3 + $0x30] sm:$0xff] }
 0x157   :  { %6582 = vmatmul.mubr.msk.f32.vlgmr.msra.gmra.mxu0 %vm43_vm0, %v7291_v41  ;;  %6593 = vmatmul.mubr.msk.f32.vlgmr.msra.gmra.mxu1 %vm43_vm0, %v7291_v41 }
 0x158   :  { %6595 = vmatprep.subr.mxu0 %v136_v0  ;;  %6606 = vmatprep.subr.mxu1 %v140_v1 }
 0x159   :  { %6596 = vmatpush3.msra.mxu0 %v136_v0  ;;  %6603 = vmatprep.mubr.msk.f32.mxu0 %vm43_vm0, %v7282_v37 }
 0x15a   :  { %6607 = vmatpush3.msra.mxu1 %v140_v1  ;;  %6614 = vmatprep.mubr.msk.f32.mxu1 %vm43_vm0, %v7282_v37 }
 0x15b   :  { %6597 = vmatprep.subr.mxu0 %v135_v2  ;;  %6608 = vmatprep.subr.mxu1 %v139_v3 }
 0x15c   :  { %6598 = vmatpush3.msra.mxu0 %v135_v2  ;;  %6609 = vmatpush3.msra.mxu1 %v139_v3  ;;  %v166_v2 = vld [vmem:[%s8349_s3 + $0x88] sm:$0xff] }
 0x15d   :  { %6599 = vmatprep.subr.mxu0 %v134_v4  ;;  %6610 = vmatprep.subr.mxu1 %v138_v5 }
 0x15e   :  { %6600 = vmatpush3.msra.mxu0 %v134_v4  ;;  %6611 = vmatpush3.msra.mxu1 %v138_v5  ;;  %v165_v5 = vld [vmem:[%s8349_s3 + $0x80] sm:$0xff] }
 0x15f   :  { %6601 = vmatprep.subr.mxu0 %v133_v6  ;;  %6612 = vmatprep.subr.mxu1 %v137_v7 }
 0x160   :  { %6602 = vmatpush3.msra.mxu0 %v133_v6  ;;  %6613 = vmatpush3.msra.mxu1 %v137_v7 }
 0x161   :  { %6604 = vmatmul.mubr.msk.f32.vlgmr.msra.gmra.mxu0 %vm43_vm0, %v7291_v41  ;;  %6615 = vmatmul.mubr.msk.f32.vlgmr.msra.gmra.mxu1 %vm43_vm0, %v7291_v41 }
 0x162   :  { %6617 = vmatprep.subr.mxu0 %v144_v8  ;;  %6628 = vmatprep.subr.mxu1 %v148_v9 }
 0x163   :  { %6618 = vmatpush3.msra.mxu0 %v144_v8  ;;  %6625 = vmatprep.mubr.msk.f32.mxu0 %vm43_vm0, %v7282_v37 }
 0x164   :  { %6629 = vmatpush3.msra.mxu1 %v148_v9  ;;  %6636 = vmatprep.mubr.msk.f32.mxu1 %vm43_vm0, %v7282_v37 }
 0x165   :  { %6619 = vmatprep.subr.mxu0 %v143_v10  ;;  %6630 = vmatprep.subr.mxu1 %v147_v11 }
 0x166   :  { %6620 = vmatpush3.msra.mxu0 %v143_v10  ;;  %6631 = vmatpush3.msra.mxu1 %v147_v11 }
 0x167   :  { %6621 = vmatprep.subr.mxu0 %v142_v12  ;;  %6632 = vmatprep.subr.mxu1 %v146_v13 }
 0x168   :  { %6622 = vmatpush3.msra.mxu0 %v142_v12  ;;  %6633 = vmatpush3.msra.mxu1 %v146_v13 }
 0x169   :  { %6623 = vmatprep.subr.mxu0 %v141_v14  ;;  %6634 = vmatprep.subr.mxu1 %v145_v15 }
 0x16a   :  { %6624 = vmatpush3.msra.mxu0 %v141_v14  ;;  %6635 = vmatpush3.msra.mxu1 %v145_v15  ;;  %v76_v14 = vld [vmem:[%s8347_s1 + $0x8] sm:$0xff] }
 0x16b   :  { %6626 = vmatmul.mubr.msk.f32.vlgmr.msra.gmra.mxu0 %vm43_vm0, %v7291_v41  ;;  %6637 = vmatmul.mubr.msk.f32.vlgmr.msra.gmra.mxu1 %vm43_vm0, %v7291_v41 }
 0x16c   :  { %6644 = vmatprep.subr.mxu1 %v7175_v16  ;;  %6639 = vmatprep.subr.mxu0 %v7175_v16 }
 0x16d   :  { %6646 = vmatprep.mubr.msk.f32.mxu1 %vm7176_vm1, %v7175_v16  ;;  %6641 = vmatprep.mubr.msk.f32.mxu0 %vm7176_vm1, %v7175_v16 }
 0x1fa   :  { %v6517_v17 = vpop.f32.mrf.mxu0  ;;  %v6528_v18 = vpop.f32.mrf.mxu1 }
 0x1fb   :  { %v251_v35 = vadd.f32 %v6517_v17, %v150_v29  ;;  %v326_v45 = vadd.f32 %v6528_v18, %v152_v39  ;;  %v75_v18 = vld [vmem:[%s8347_s1] sm:$0xff] }
 0x1fc   :  { %v245_v19 = vpop.f32.mrf.mxu0  ;;  %v320_v20 = vpop.f32.mrf.mxu1  ;;  %v79_v39 = vld [vmem:[%s8347_s1 + $0x20] sm:$0xff] }
 0x1fd   :  { %v246_v42 = vadd.f32 %v245_v19, %v149_v33  ;;  %v321_v47 = vadd.f32 %v320_v20, %v151_v43 }
 0x203   :  { %v6539_v21 = vpop.f32.mrf.mxu0  ;;  %v7457_v22 = vpop.f32.mrf.mxu1 }
 0x204   :  { %v401_v57 = vadd.f32 %v6539_v21, %v154_v51  ;;  %v476_v1 = vadd.f32 %v7457_v22, %v156_v60  ;;  %v78_v22 = vld [vmem:[%s8347_s1 + $0x18] sm:$0xff] }
 0x205   :  { %v395_v23 = vpop.f32.mrf.mxu0  ;;  %v7459_v24 = vpop.f32.mrf.mxu1 }
 0x206   :  { %v396_v62 = vadd.f32 %v395_v23, %v153_v55  ;;  %v471_v3 = vadd.f32 %v7459_v24, %v155_v63 }
 0x20d   :  { %v6561_v26 = vpop.f32.mrf.mxu0  ;;  %v6572_v27 = vpop.f32.mrf.mxu1 }
 0x20e   :  { %v551_v30 = vadd.f32 %v6561_v26, %v158_v25  ;;  %v626_v40 = vadd.f32 %v6572_v27, %v160_v31  ;;  %v77_v27 = vld [vmem:[%s8347_s1 + $0x10] sm:$0xff] }
 0x20f   :  { %v545_v32 = vpop.f32.mrf.mxu0  ;;  %v620_v36 = vpop.f32.mrf.mxu1 }
 0x210   :  { %v546_v34 = vadd.f32 %v545_v32, %v157_v28  ;;  %6645 = vmatpush3.xpose.msk.msra.mxu1 %vm1079_vm2, %v551_v30  ;;  %v621_v44 = vadd.f32 %v620_v36, %v159_v38 }
 0x211   :  { %6654 = vmatprep.subr.mxu1 %v7175_v16 }
 0x212   :  { %6640 = vmatpush3.xpose.msk.msra.mxu0 %vm1079_vm2, %v546_v34 }
 0x213   :  { %6647 = vmatmul.mubr.msk.f32.vlgmr.msra.gmra.mxu1 %vm1079_vm2, %v251_v35  ;;  %6649 = vmatprep.subr.mxu0 %v7175_v16  ;;  %v80_v35 = vld [vmem:[%s8347_s1 + $0x28] sm:$0xff] }
 0x214   :  { %6655 = vmatpush3.xpose.msk.msra.mxu1 %vm1079_vm2, %v626_v40  ;;  %6656 = vmatprep.mubr.msk.f32.mxu1 %vm7176_vm1, %v7175_v16 }
 0x215   :  { %6642 = vmatmul.mubr.msk.f32.vlgmr.msra.gmra.mxu0 %vm1079_vm2, %v246_v42  ;;  %6664 = vmatprep.subr.mxu1 %v7175_v16 }
 0x216   :  { %6650 = vmatpush3.xpose.msk.msra.mxu0 %vm1079_vm2, %v621_v44  ;;  %6651 = vmatprep.mubr.msk.f32.mxu0 %vm7176_vm1, %v7175_v16  ;;  %v82_v44 = vld [vmem:[%s8347_s1 + $0x38] sm:$0xff] }
 0x217   :  { %v6583_v48 = vpop.f32.mrf.mxu0  ;;  %v6594_v49 = vpop.f32.mrf.mxu1  ;;  %6657 = vmatmul.mubr.msk.f32.vlgmr.msra.gmra.mxu1 %vm1079_vm2, %v326_v45  ;;  %6659 = vmatprep.subr.mxu0 %v7175_v16 }
 0x218   :  { %v701_v52 = vadd.f32 %v6583_v48, %v162_v46  ;;  %6666 = vmatprep.mubr.msk.f32.mxu1 %vm7176_vm1, %v7175_v16  ;;  %v776_v61 = vadd.f32 %v6594_v49, %v164_v53  ;;  %v81_v49 = vld [vmem:[%s8347_s1 + $0x30] sm:$0xff] }
 0x219   :  { %v695_v54 = vpop.f32.mrf.mxu0  ;;  %6652 = vmatmul.mubr.msk.f32.vlgmr.msra.gmra.mxu0 %vm1079_vm2, %v321_v47  ;;  %v770_v58 = vpop.f32.mrf.mxu1 }
 0x21a   :  { %v696_v56 = vadd.f32 %v695_v54, %v161_v50  ;;  %6665 = vmatpush3.xpose.msk.msra.mxu1 %vm1079_vm2, %v701_v52  ;;  %6661 = vmatprep.mubr.msk.f32.mxu0 %vm7176_vm1, %v7175_v16  ;;  %v771_v0 = vadd.f32 %v770_v58, %v163_v59 }
 0x21b   :  { %6674 = vmatprep.subr.mxu1 %v7175_v16 }
 0x21c   :  { %6660 = vmatpush3.xpose.msk.msra.mxu0 %vm1079_vm2, %v696_v56 }
 0x21d   :  { %6667 = vmatmul.mubr.msk.f32.vlgmr.msra.gmra.mxu1 %vm1079_vm2, %v401_v57  ;;  %6669 = vmatprep.subr.mxu0 %v7175_v16 }
 0x21e   :  { %6675 = vmatpush3.xpose.msk.msra.mxu1 %vm1079_vm2, %v776_v61  ;;  %6676 = vmatprep.mubr.msk.f32.mxu1 %vm7176_vm1, %v7175_v16 }
 0x21f   :  { %6662 = vmatmul.mubr.msk.f32.vlgmr.msra.gmra.mxu0 %vm1079_vm2, %v396_v62  ;;  %6684 = vmatprep.subr.mxu1 %v7175_v16 }
 0x220   :  { %6670 = vmatpush3.xpose.msk.msra.mxu0 %vm1079_vm2, %v771_v0  ;;  %6671 = vmatprep.mubr.msk.f32.mxu0 %vm7176_vm1, %v7175_v16 }
 0x221   :  { %v6605_v4 = vpop.f32.mrf.mxu0  ;;  %6677 = vmatmul.mubr.msk.f32.vlgmr.msra.gmra.mxu1 %vm1079_vm2, %v476_v1  ;;  %6679 = vmatprep.subr.mxu0 %v7175_v16  ;;  %v7559_v9 = vpop.f32.mrf.mxu1 }
 0x222   :  { %v851_v6 = vadd.f32 %v6605_v4, %v166_v2  ;;  %6686 = vmatprep.mubr.msk.f32.mxu1 %vm7176_vm1, %v7175_v16 }
 0x223   :  { %v845_v7 = vpop.f32.mrf.mxu0  ;;  %6672 = vmatmul.mubr.msk.f32.vlgmr.msra.gmra.mxu0 %vm1079_vm2, %v471_v3  ;;  %v7561_v10 = vpop.f32.mrf.mxu1 }
 0x224   :  { %v846_v8 = vadd.f32 %v845_v7, %v165_v5  ;;  %6685 = vmatpush3.msra.mxu1 %v851_v6  ;;  %6681 = vmatprep.mubr.msk.f32.mxu0 %vm7176_vm1, %v7175_v16 }
 0x225   :  { %6694 = vmatprep.subr.mxu1 %v7175_v16 }
 0x226   :  { %6680 = vmatpush3.msra.mxu0 %v846_v8 }
 0x227   :  { %6689 = vmatprep.subr.mxu0 %v7175_v16 }
 0x22b   :  { %v7563_v11 = vpop.f32.mrf.mxu1  ;;  %v7565_v12 = vpop.f32.mrf.mxu0 }
 0x22d   :  { %v7567_v13 = vpop.f32.mrf.mxu1  ;;  %v7572_v15 = vpop.f32.mrf.mxu0 }
 0x2d3   :  { %v1228_v17 = vpop.f32.mrf.mxu1 }
 0x2d4   :  { %v1229_v19 = vadd.f32 %v1228_v17, %v76_v14 }
 0x2d5   :  { %v1152_v20 = vpop.f32.mrf.mxu0  ;;  %v6648_v21 = vpop.f32.mrf.mxu1 }
 0x2d6   :  { %v1153_v23 = vadd.f32 %v1152_v20, %v75_v18  ;;  %v1691_v24 = vsel %vm1079_vm2, %v1229_v19, -inf }
 0x2d7   :  { %1692 = vmax.xlane.f32.xlu1 %v1691_v24  ;;  %v6643_v25 = vpop.f32.mrf.mxu0  ;;  %v1380_v26 = vpop.f32.mrf.mxu1 }
 0x2d8   :  { %v1381_v28 = vadd.f32 %v1380_v26, %v78_v22  ;;  %v1688_v29 = vsel %vm1079_vm2, %v1153_v23, -inf }
 0x2d9   :  { %v6658_v30 = vpop.f32.mrf.mxu1  ;;  %1689 = vmax.xlane.f32.xlu0 %v1688_v29  ;;  %v1304_v31 = vpop.f32.mrf.mxu0 }
 0x2da   :  { %v1305_v32 = vadd.f32 %v1304_v31, %v77_v27  ;;  %v1697_v33 = vsel %vm1079_vm2, %v1381_v28, -inf }
 0x2db   :  { %1698 = vmax.xlane.f32.xlu1 %v1697_v33  ;;  %v6653_v34 = vpop.f32.mrf.mxu0 }
 0x2dc   :  { %v1694_v36 = vsel %vm1079_vm2, %v1305_v32, -inf }
 0x2dd   :  { %v1532_v38 = vpop.f32.mrf.mxu1  ;;  %1695 = vmax.xlane.f32.xlu0 %v1694_v36 }
 0x2de   :  { %v1533_v40 = vadd.f32 %v1532_v38, %v80_v35 }
 0x2df   :  { %v6668_v42 = vpop.f32.mrf.mxu1  ;;  %v1456_v43 = vpop.f32.mrf.mxu0 }
 0x2e0   :  { %v1457_v45 = vadd.f32 %v1456_v43, %v79_v39  ;;  %v1703_v46 = vsel %vm1079_vm2, %v1533_v40, -inf }
 0x2e1   :  { %1704 = vmax.xlane.f32.xlu1 %v1703_v46  ;;  %v6663_v47 = vpop.f32.mrf.mxu0  ;;  %v1684_v48 = vpop.f32.mrf.mxu1 }
 0x2e2   :  { %v1685_v50 = vadd.f32 %v1684_v48, %v82_v44  ;;  %v1700_v51 = vsel %vm1079_vm2, %v1457_v45, -inf }
 0x2e3   :  { %v6678_v52 = vpop.f32.mrf.mxu1  ;;  %1701 = vmax.xlane.f32.xlu0 %v1700_v51  ;;  %v1608_v53 = vpop.f32.mrf.mxu0 }
 0x2e4   :  { %v1609_v54 = vadd.f32 %v1608_v53, %v81_v49  ;;  %v1709_v55 = vsel %vm1079_vm2, %v1685_v50, -inf  ;;  %v168_v49 = vld [vmem:[%s8349_s3 + $0x98] sm:$0xff]  ;;  %v167_v52 = vld [vmem:[%s8349_s3 + $0x90] sm:$0xff] }
 0x2e5   :  { %1710 = vmax.xlane.f32.xlu1 %v1709_v55  ;;  %v6673_v56 = vpop.f32.mrf.mxu0  ;;  %v926_v55 = vadd.f32 %v7559_v9, %v168_v49  ;;  %v169_v9 = vld [vmem:[%s8349_s3 + $0xa0] sm:$0xff] }
 0x2e6   :  { %v1706_v57 = vsel %vm1079_vm2, %v1609_v54, -inf }
 0x2e7   :  { %1707 = vmax.xlane.f32.xlu0 %v1706_v57  ;;  %v170_v57 = vld [vmem:[%s8349_s3 + $0xa8] sm:$0xff] }
 0x360   :  { %v1693_v58 = vpop.xlane.xlu1 %1692 }
 0x361   :  { %v1713_v59 = vsub.f32 %v1229_v19, %v1693_v58 }
 0x362   :  { %v1690_v60 = vpop.xlane.xlu0 %1689 }
 0x363   :  { %v1722_v61 = vmul.f32 1.442695, %v1713_v59  ;;  %v1712_v62 = vsub.f32 %v1153_v23, %v1690_v60  ;;  %v921_v60 = vadd.f32 %v7561_v10, %v167_v52 }
 0x364   :  { %v1699_v63 = vpop.xlane.xlu1 %1698 }
 0x365   :  { %7049 = vpow2.f32 %v1722_v61  ;;  %v1720_v0 = vmul.f32 1.442695, %v1712_v62  ;;  %v1715_v1 = vsub.f32 %v1381_v28, %v1699_v63  ;;  %v1001_v63 = vadd.f32 %v7565_v12, %v170_v57 }
 0x366   :  { %v1696_v2 = vpop.xlane.xlu0 %1695 }
 0x367   :  { %7051 = vpow2.f32 %v1720_v0  ;;  %v1726_v3 = vmul.f32 1.442695, %v1715_v1  ;;  %v1714_v4 = vsub.f32 %v1305_v32, %v1696_v2  ;;  %v996_v0 = vadd.f32 %v7572_v15, %v169_v9  ;;  %v172_v1 = vld [vmem:[%s8349_s3 + $0xb8] sm:$0xff]  ;;  %v171_v15 = vld [vmem:[%s8349_s3 + $0xb0] sm:$0xff] }
 0x369   :  { %7053 = vpow2.f32 %v1726_v3  ;;  %v1724_v5 = vmul.f32 1.442695, %v1714_v4  ;;  %v1076_v4 = vadd.f32 %v7563_v11, %v172_v1 }
 0x36a   :  { %v1705_v6 = vpop.xlane.xlu1 %1704 }
 0x36b   :  { %7055 = vpow2.f32 %v1724_v5  ;;  %v1717_v7 = vsub.f32 %v1533_v40, %v1705_v6 }
 0x36c   :  { %v1702_v8 = vpop.xlane.xlu0 %1701 }
 0x36d   :  { %v1730_v14 = vmul.f32 1.442695, %v1717_v7  ;;  %v1716_v17 = vsub.f32 %v1457_v45, %v1702_v8  ;;  %v1071_v7 = vadd.f32 %v7567_v13, %v171_v15  ;;  %v2360_v13 = vld [vmem:[%s8352_s6] sm:$0xff]  ;;  %v2730_v15 = vld [vmem:[%s8353_s7 + $0x10] sm:$0xff] }
 0x36e   :  { %v1711_v18 = vpop.xlane.xlu1 %1710 }
 0x36f   :  { %7057 = vpow2.f32 %v1730_v14  ;;  %v1728_v19 = vmul.f32 1.442695, %v1716_v17  ;;  %v1719_v20 = vsub.f32 %v1685_v50, %v1711_v18  ;;  %v2361_v17 = vld [vmem:[%s8352_s6 + $0x8] sm:$0xff]  ;;  %v2362_v18 = vld [vmem:[%s8352_s6 + $0x10] sm:$0xff] }
 0x370   :  { %v1708_v21 = vpop.xlane.xlu0 %1707 }
 0x371   :  { %7059 = vpow2.f32 %v1728_v19  ;;  %v1734_v22 = vmul.f32 1.442695, %v1719_v20  ;;  %v1718_v23 = vsub.f32 %v1609_v54, %v1708_v21  ;;  %v2363_v19 = vld [vmem:[%s8352_s6 + $0x18] sm:$0xff] }
 0x372   :  { %v7050_v24 = vpop.eup %7049 }
 0x373   :  { %7061 = vpow2.f32 %v1734_v22  ;;  %v1732_v25 = vmul.f32 1.442695, %v1718_v23  ;;  %v1739_v26 = vsel %vm1079_vm2, %v7050_v24, 0.0 }
 0x374   :  { %v7052_v27 = vpop.eup %7051  ;;  %1740 = vadd.xlane.f32.xlu1 %v1739_v26 }
 0x375   :  { %7063 = vpow2.f32 %v1732_v25  ;;  %v1736_v28 = vsel %vm1079_vm2, %v7052_v27, 0.0 }
 0x376   :  { %v7054_v29 = vpop.eup %7053  ;;  %1737 = vadd.xlane.f32.xlu0 %v1736_v28 }
 0x377   :  { %v1745_v30 = vsel %vm1079_vm2, %v7054_v29, 0.0 }
 0x378   :  { %v7056_v31 = vpop.eup %7055  ;;  %1746 = vadd.xlane.f32.xlu1 %v1745_v30 }
 0x379   :  { %v1742_v32 = vsel %vm1079_vm2, %v7056_v31, 0.0 }
 0x37a   :  { %1743 = vadd.xlane.f32.xlu0 %v1742_v32 }
 0x37c   :  { %v7058_v33 = vpop.eup %7057 }
 0x37d   :  { %v1751_v34 = vsel %vm1079_vm2, %v7058_v33, 0.0 }
 0x37e   :  { %v7608_v35 = vpop.eup %7059  ;;  %1752 = vadd.xlane.f32.xlu1 %v1751_v34 }
 0x37f   :  { %v1748_v36 = vsel %vm1079_vm2, %v7608_v35, 0.0 }
 0x380   :  { %v7612_v38 = vpop.eup %7061  ;;  %1749 = vadd.xlane.f32.xlu0 %v1748_v36 }
 0x381   :  { %v1757_v39 = vsel %vm1079_vm2, %v7612_v38, 0.0 }
 0x382   :  { %v7616_v40 = vpop.eup %7063  ;;  %1758 = vadd.xlane.f32.xlu1 %v1757_v39 }
 0x383   :  { %v1754_v42 = vsel %vm1079_vm2, %v7616_v40, 0.0 }
 0x384   :  { %1755 = vadd.xlane.f32.xlu0 %v1754_v42 }
 0x3fd   :  { %v1741_v43 = vpop.xlane.xlu1 %1740 }
 0x3fe   :  { %7065 = vrcp.f32 %v1741_v43 }
 0x3ff   :  { %v1738_v44 = vpop.xlane.xlu0 %1737 }
 0x400   :  { %7067 = vrcp.f32 %v1738_v44 }
 0x401   :  { %v1747_v45 = vpop.xlane.xlu1 %1746 }
 0x402   :  { %7069 = vrcp.f32 %v1747_v45 }
 0x403   :  { %v1744_v46 = vpop.xlane.xlu0 %1743 }
 0x404   :  { %7071 = vrcp.f32 %v1744_v46 }
 0x407   :  { %v1753_v47 = vpop.xlane.xlu1 %1752 }
 0x408   :  { %7073 = vrcp.f32 %v1753_v47  ;;  %v6012_v47 = vld [vmem:[%s8348_s2 + $0x68] sm:$0xff] }
 0x409   :  { %v1750_v48 = vpop.xlane.xlu0 %1749 }
 0x40a   :  { %7075 = vrcp.f32 %v1750_v48 }
 0x40b   :  { %v7066_v50 = vpop.eup %7065  ;;  %v1759_v51 = vpop.xlane.xlu1 %1758 }
 0x40c   :  { %7077 = vrcp.f32 %v1759_v51  ;;  %v1769_v53 = vmul.f32 %v7066_v50, %v7050_v24  ;;  %v6011_v51 = vld [vmem:[%s8348_s2 + $0x60] sm:$0xff] }
 0x40d   :  { %v7068_v54 = vpop.eup %7067  ;;  %v1756_v56 = vpop.xlane.xlu0 %1755 }
 0x40e   :  { %7079 = vrcp.f32 %v1756_v56  ;;  %6687 = vmatmul.mubr.msk.f32.vlgmr.msra.gmra.mxu1 %vm1079_vm2, %v1769_v53  ;;  %v1768_v58 = vmul.f32 %v7068_v54, %v7052_v27 }
 0x40f   :  { %v7070_v59 = vpop.eup %7069  ;;  %6695 = vmatpush3.msra.mxu1 %v926_v55  ;;  %6696 = vmatprep.mubr.msk.f32.mxu1 %vm7176_vm1, %v7175_v16 }
 0x410   :  { %6682 = vmatmul.mubr.msk.f32.vlgmr.msra.gmra.mxu0 %vm1079_vm2, %v1768_v58  ;;  %6704 = vmatprep.subr.mxu1 %v7175_v16  ;;  %v1771_v61 = vmul.f32 %v7070_v59, %v7054_v29 }
 0x411   :  { %v7072_v62 = vpop.eup %7071  ;;  %6690 = vmatpush3.msra.mxu0 %v921_v60  ;;  %6691 = vmatprep.mubr.msk.f32.mxu0 %vm7176_vm1, %v7175_v16 }
 0x412   :  { %6697 = vmatmul.mubr.msk.f32.vlgmr.msra.gmra.mxu1 %vm1079_vm2, %v1771_v61  ;;  %6699 = vmatprep.subr.mxu0 %v7175_v16  ;;  %v1770_v10 = vmul.f32 %v7072_v62, %v7056_v31 }
 0x413   :  { %6705 = vmatpush3.msra.mxu1 %v1001_v63  ;;  %6706 = vmatprep.mubr.msk.f32.mxu1 %vm7176_vm1, %v7175_v16 }
 0x414   :  { %6692 = vmatmul.mubr.msk.f32.vlgmr.msra.gmra.mxu0 %vm1079_vm2, %v1770_v10  ;;  %6714 = vmatprep.subr.mxu1 %v7175_v16 }
 0x415   :  { %v7074_v12 = vpop.eup %7073  ;;  %6700 = vmatpush3.msra.mxu0 %v996_v0  ;;  %6701 = vmatprep.mubr.msk.f32.mxu0 %vm7176_vm1, %v7175_v16 }
 0x416   :  { %v1773_v2 = vmul.f32 %v7074_v12, %v7058_v33  ;;  %6709 = vmatprep.subr.mxu0 %v7175_v16 }
 0x417   :  { %v7076_v3 = vpop.eup %7075 }
 0x418   :  { %6707 = vmatmul.mubr.msk.f32.vlgmr.msra.gmra.mxu1 %vm1079_vm2, %v1773_v2  ;;  %v1772_v5 = vmul.f32 %v7076_v3, %v7608_v35  ;;  %v2729_v2 = vld [vmem:[%s8353_s7 + $0x8] sm:$0xff]  ;;  %v2728_v3 = vld [vmem:[%s8353_s7] sm:$0xff] }
 0x419   :  { %v7078_v6 = vpop.eup %7077  ;;  %6715 = vmatpush3.msra.mxu1 %v1076_v4  ;;  %6716 = vmatprep.mubr.msk.f32.mxu1 %vm7176_vm1, %v7175_v16 }
 0x41a   :  { %6702 = vmatmul.mubr.msk.f32.vlgmr.msra.gmra.mxu0 %vm1079_vm2, %v1772_v5  ;;  %v1775_v8 = vmul.f32 %v7078_v6, %v7612_v38  ;;  %6724 = vmatprep.subr.mxu1 %v2361_v17 }
 0x41b   :  { %v7080_v14 = vpop.eup %7079  ;;  %6710 = vmatpush3.msra.mxu0 %v1071_v7  ;;  %6711 = vmatprep.mubr.msk.f32.mxu0 %vm7176_vm1, %v7175_v16 }
 0x41c   :  { %6717 = vmatmul.mubr.msk.f32.vlgmr.msra.gmra.mxu1 %vm1079_vm2, %v1775_v8  ;;  %v1774_v11 = vmul.f32 %v7080_v14, %v7616_v40  ;;  %6719 = vmatprep.subr.mxu0 %v2360_v13 }
 0x41d   :  { %6725 = vmatpush3.msra.mxu1 %v2361_v17  ;;  %v6004_v17 = vld [vmem:[%s8348_s2 + $0x28] sm:$0xff] }
 0x41e   :  { %6712 = vmatmul.mubr.msk.f32.vlgmr.msra.gmra.mxu0 %vm1079_vm2, %v1774_v11  ;;  %6734 = vmatprep.subr.mxu1 %v2363_v19 }
 0x41f   :  { %6720 = vmatpush3.msra.mxu0 %v2360_v13 }
 0x420   :  { %6729 = vmatprep.subr.mxu0 %v2362_v18 }
 0x4ce   :  { %v1918_v20 = vpop.f32.mrf.mxu1 }
 0x4d0   :  { %v1845_v21 = vpop.f32.mrf.mxu0  ;;  %v6688_v22 = vpop.f32.mrf.mxu1 }
 0x4d1   :  { %6721 = vmatprep.mubr.msk.f32.mxu0 %vm1079_vm2, %v1845_v21  ;;  %v6005_v21 = vld [vmem:[%s8348_s2 + $0x30] sm:$0xff] }
 0x4d2   :  { %v6683_v23 = vpop.f32.mrf.mxu0  ;;  %v2064_v24 = vpop.f32.mrf.mxu1  ;;  %6722 = vmatmul.mubr.msk.f32.vlgmr.msra.gmra.mxu0 %vm1079_vm2, %v1918_v20 }
 0x4d3   :  { %6730 = vmatpush3.msra.mxu0 %v2362_v18 }
 0x4d4   :  { %v1991_v25 = vpop.f32.mrf.mxu0  ;;  %v6698_v26 = vpop.f32.mrf.mxu1 }
 0x4d5   :  { %6726 = vmatprep.mubr.msk.f32.mxu1 %vm1079_vm2, %v1991_v25 }
 0x4d6   :  { %v6693_v27 = vpop.f32.mrf.mxu0  ;;  %6727 = vmatmul.mubr.msk.f32.vlgmr.msra.gmra.mxu1 %vm1079_vm2, %v2064_v24  ;;  %v6006_v24 = vld [vmem:[%s8348_s2 + $0x38] sm:$0xff] }
 0x4d7   :  { %6735 = vmatpush3.msra.mxu1 %v2363_v19  ;;  %v6003_v19 = vld [vmem:[%s8348_s2 + $0x20] sm:$0xff]  ;;  %v2876_v27 = vld [vmem:[%s8354_s8 + $0x38] sm:$0xff] }
 0x4d8   :  { %v2210_v28 = vpop.f32.mrf.mxu1  ;;  %6750 = vmatprep.subr.mxu1 %v2876_v27 }
 0x4da   :  { %v2137_v29 = vpop.f32.mrf.mxu0  ;;  %v6708_v30 = vpop.f32.mrf.mxu1 }
 0x4db   :  { %6731 = vmatprep.mubr.msk.f32.mxu0 %vm1079_vm2, %v2137_v29  ;;  %v2874_v29 = vld [vmem:[%s8354_s8 + $0x28] sm:$0xff]  ;;  %v2873_v30 = vld [vmem:[%s8354_s8 + $0x20] sm:$0xff] }
 0x4dc   :  { %v6703_v31 = vpop.f32.mrf.mxu0  ;;  %v2356_v32 = vpop.f32.mrf.mxu1  ;;  %6732 = vmatmul.mubr.msk.f32.vlgmr.msra.gmra.mxu0 %vm1079_vm2, %v2210_v28  ;;  %v2875_v28 = vld [vmem:[%s8354_s8 + $0x30] sm:$0xff] }
 0x4dd   :  { %v2872_v31 = vld [vmem:[%s8354_s8 + $0x18] sm:$0xff] }
 0x4de   :  { %v2283_v33 = vpop.f32.mrf.mxu0  ;;  %v6718_v34 = vpop.f32.mrf.mxu1 }
 0x4df   :  { %6736 = vmatprep.mubr.msk.f32.mxu1 %vm1079_vm2, %v2283_v33  ;;  %v2870_v33 = vld [vmem:[%s8354_s8 + $0x8] sm:$0xff]  ;;  %v2869_v34 = vld [vmem:[%s8354_s8] sm:$0xff] }
 0x4e0   :  { %v6713_v35 = vpop.f32.mrf.mxu0  ;;  %6737 = vmatmul.mubr.msk.f32.vlgmr.msra.gmra.mxu1 %vm1079_vm2, %v2356_v32  ;;  %v2871_v32 = vld [vmem:[%s8354_s8 + $0x10] sm:$0xff] }
 0x4e1   :  { %6751 = vmatpush3.msra.mxu1 %v2876_v27  ;;  %v2733_v35 = vld [vmem:[%s8350_s4 + $0x8] sm:$0xff] }
 0x4e2   :  { %6752 = vmatprep.subr.mxu1 %v2875_v28 }
 0x4e3   :  { %6753 = vmatpush3.msra.mxu1 %v2875_v28 }
 0x4e4   :  { %6754 = vmatprep.subr.mxu1 %v2874_v29 }
 0x4e5   :  { %6755 = vmatpush3.msra.mxu1 %v2874_v29 }
 0x4e6   :  { %6756 = vmatprep.subr.mxu1 %v2873_v30 }
 0x4e7   :  { %6757 = vmatpush3.msra.mxu1 %v2873_v30  ;;  %v6014_v30 = vld [vmem:[%s8348_s2 + $0x78] sm:$0xff] }
 0x4e8   :  { %6758 = vmatprep.subr.mxu1 %v2872_v31 }
 0x4e9   :  { %6759 = vmatpush3.msra.mxu1 %v2872_v31 }
 0x4ea   :  { %6760 = vmatprep.subr.mxu1 %v2871_v32 }
 0x4eb   :  { %6761 = vmatpush3.msra.mxu1 %v2871_v32  ;;  %v6013_v32 = vld [vmem:[%s8348_s2 + $0x70] sm:$0xff] }
 0x4ec   :  { %6762 = vmatprep.subr.mxu1 %v2870_v33 }
 0x4ed   :  { %6763 = vmatpush3.msra.mxu1 %v2870_v33 }
 0x4ee   :  { %6764 = vmatprep.subr.mxu1 %v2869_v34 }
 0x4ef   :  { %6765 = vmatpush3.msra.mxu1 %v2869_v34 }
 0x592   :  { %v6723_v36 = vpop.f32.mrf.mxu0 }
 0x594   :  { %v2436_v39 = vpop.f32.mrf.mxu0 }
 0x596   :  { %v6728_v38 = vpop.f32.mrf.mxu1 }
 0x597   :  { %v2689_v43 = vadd.f32 %v6728_v38, %v6723_v36  ;;  %v2732_v38 = vld [vmem:[%s8350_s4] sm:$0xff] }
 0x598   :  { %v2517_v40 = vpop.f32.mrf.mxu1 }
 0x599   :  { %v2688_v45 = vadd.f32 %v2517_v40, %v2436_v39 }
 0x59c   :  { %v6733_v42 = vpop.f32.mrf.mxu0 }
 0x59d   :  { %v2691_v46 = vadd.f32 %v6733_v42, %v2689_v43 }
 0x59e   :  { %v2598_v44 = vpop.f32.mrf.mxu0 }
 0x59f   :  { %v2690_v49 = vadd.f32 %v2688_v45, %v2598_v44 }
 0x5a0   :  { %v6738_v48 = vpop.f32.mrf.mxu1 }
 0x5a1   :  { %v2693_v50 = vadd.f32 %v6738_v48, %v2691_v46 }
 0x5a2   :  { %v2679_v52 = vpop.f32.mrf.mxu1 }
 0x5a3   :  { %v2695_v53 = vadd.f32 %v6012_v47, %v2693_v50  ;;  %v2692_v54 = vadd.f32 %v2690_v49, %v2679_v52 }
 0x5a5   :  { %v2694_v55 = vadd.f32 %v6011_v51, %v2692_v54  ;;  %v2697_v56 = vadd.f32 %v2695_v53, %v7291_v41 }
 0x5a7   :  { %v2701_v57 = vsel %vm43_vm0, %v2697_v56, 0.0  ;;  %v2696_v58 = vadd.f32 %v2694_v55, %v7282_v37  ;;  %v2731_v37 = vld [vmem:[%s8353_s7 + $0x18] sm:$0xff] }
 0x5a8   :  { %2702 = vadd.xlane.f32.xlu1 %v2701_v57  ;;  %6739 = vmatprep.subr.mxu0 %v2731_v37 }
 0x5a9   :  { %v2698_v59 = vsel %vm43_vm0, %v2696_v58, 0.0  ;;  %6740 = vmatpush3.msra.mxu0 %v2731_v37 }
 0x5aa   :  { %2699 = vadd.xlane.f32.xlu0 %v2698_v59  ;;  %6741 = vmatprep.subr.mxu0 %v2730_v15 }
 0x5ab   :  { %6742 = vmatpush3.msra.mxu0 %v2730_v15 }
 0x5ac   :  { %6743 = vmatprep.subr.mxu0 %v2729_v2 }
 0x5ad   :  { %6744 = vmatpush3.msra.mxu0 %v2729_v2 }
 0x5ae   :  { %6745 = vmatprep.subr.mxu0 %v2728_v3 }
 0x5af   :  { %6746 = vmatpush3.msra.mxu0 %v2728_v3 }
 0x631   :  { %v2703_v60 = vpop.xlane.xlu1 %2702 }
 0x632   :  { %v2705_v9 = vmul.f32 0.03125, %v2703_v60 }
 0x633   :  { %v2700_v61 = vpop.xlane.xlu0 %2699 }
 0x634   :  { %v2707_v62 = vsub.f32 %v2697_v56, %v2705_v9  ;;  %v2704_v63 = vmul.f32 0.03125, %v2700_v61 }
 0x636   :  { %v2706_v10 = vsub.f32 %v2696_v58, %v2704_v63  ;;  %v2709_v0 = vmul.f32 %v2707_v62, %v2707_v62 }
 0x638   :  { %v2713_v1 = vsel %vm43_vm0, %v2709_v0, 0.0  ;;  %v2708_v12 = vmul.f32 %v2706_v10, %v2706_v10 }
 0x639   :  { %2714 = vadd.xlane.f32.xlu1 %v2713_v1 }
 0x63a   :  { %v2710_v41 = vsel %vm43_vm0, %v2708_v12, 0.0 }
 0x63b   :  { %2711 = vadd.xlane.f32.xlu0 %v2710_v41 }
 0x6c2   :  { %v2715_v4 = vpop.xlane.xlu1 %2714 }
 0x6c3   :  { %v2717_v5 = vmul.f32 0.03125, %v2715_v4 }
 0x6c4   :  { %v2712_v6 = vpop.xlane.xlu0 %2711 }
 0x6c5   :  { %v2719_v7 = vadd.f32 1e-05, %v2717_v5  ;;  %v2716_v8 = vmul.f32 0.03125, %v2712_v6 }
 0x6c7   :  { %7081 = vrsqrt.f32 %v2719_v7  ;;  %v2718_v14 = vadd.f32 1e-05, %v2716_v8 }
 0x6c9   :  { %7083 = vrsqrt.f32 %v2718_v14 }
 0x6d4   :  { %v7082_v11 = vpop.eup %7081 }
 0x6d5   :  { %v2723_v13 = vmul.f32 %v7082_v11, %v2707_v62 }
 0x6d6   :  { %v7084_v18 = vpop.eup %7083 }
 0x6d7   :  { %v2722_v20 = vmul.f32 %v7084_v18, %v2706_v10  ;;  %v2725_v22 = vmul.f32 %v6004_v17, %v2723_v13 }
 0x6d9   :  { %v2724_v23 = vmul.f32 %v6003_v19, %v2722_v20  ;;  %v7729_v26 = vadd.f32 %v6006_v24, %v2725_v22 }
 0x6db   :  { %v7727_v25 = vadd.f32 %v6005_v21, %v2724_v23 }
 0x6dd   :  { %6747 = vmatprep.mubr.msk.f32.mxu0 %vm43_vm0, %v7727_v25 }
 0x6de   :  { %6748 = vmatmul.mubr.msk.f32.vlgmr.msra.gmra.mxu0 %vm43_vm0, %v7729_v26 }
 0x79e   :  { %v6749_v36 = vpop.f32.mrf.mxu0 }
 0x79f   :  { %v2812_v39 = vadd.f32 %v6749_v36, %v2733_v35 }
 0x7a0   :  { %v2806_v40 = vpop.f32.mrf.mxu0 }
 0x7a1   :  { %v2818_v42 = vmul.f32 0.70710677, %v2812_v39  ;;  %v2807_v43 = vadd.f32 %v2806_v40, %v2732_v38  ;;  %v2816_v27 = vmul.f32 0.5, %v2812_v39 }
 0x7a3   :  { %v2820_v44 = vand.u32 2147483647, %v2818_v42  ;;  %v2817_v45 = vmul.f32 0.70710677, %v2807_v43  ;;  %vm2860_vm3 = vcmp.ge.f32.partialorder %v2818_v42, 0.0  ;;  %v2815_v23 = vmul.f32 0.5, %v2807_v43 }
 0x7a5   :  { %v2822_v46 = vmul.f32 0.3275911, %v2820_v44  ;;  %v2819_v47 = vand.u32 2147483647, %v2817_v45  ;;  %v2848_v51 = vsub.f32 0.0, %v2820_v44  ;;  %vm2859_vm4 = vcmp.ge.f32.partialorder %v2817_v45, 0.0 }
 0x7a7   :  { %v2824_v48 = vadd.f32 1.0, %v2822_v46  ;;  %v2821_v49 = vmul.f32 0.3275911, %v2819_v47  ;;  %v2847_v52 = vsub.f32 0.0, %v2819_v47  ;;  %v2850_v53 = vmul.f32 %v2848_v51, %v2820_v44  ;;  %v6098_v51 = vld [vmem:[%s8351_s5 + $0x1d8] sm:$0xff] }
 0x7a8   :  { %6791 = vmatprep.subr.mxu1 %v6098_v51 }
 0x7a9   :  { %7085 = vrcp.f32 %v2824_v48  ;;  %v2823_v50 = vadd.f32 1.0, %v2821_v49  ;;  %v2849_v55 = vmul.f32 %v2847_v52, %v2819_v47  ;;  %v2853_v57 = vmul.f32 1.442695, %v2850_v53  ;;  %v6089_v52 = vld [vmem:[%s8351_s5 + $0x190] sm:$0xff] }
 0x7aa   :  { %v6097_v53 = vld [vmem:[%s8351_s5 + $0x1d0] sm:$0xff] }
 0x7ab   :  { %7087 = vrcp.f32 %v2823_v50  ;;  %v2851_v9 = vmul.f32 1.442695, %v2849_v55  ;;  %v6096_v55 = vld [vmem:[%s8351_s5 + $0x1c8] sm:$0xff] }
 0x7ac   :  { %7089 = vpow2.f32 %v2853_v57  ;;  %v6095_v57 = vld [vmem:[%s8351_s5 + $0x1c0] sm:$0xff] }
 0x7ad   :  { %7091 = vpow2.f32 %v2851_v9 }
 0x7b6   :  { %v7086_v54 = vpop.eup %7085 }
 0x7b7   :  { %v2830_v56 = vmul.f32 1.0614054, %v7086_v54 }
 0x7b8   :  { %v7088_v58 = vpop.eup %7087 }
 0x7b9   :  { %v2832_v59 = vadd.f32 -1.4531521, %v2830_v56  ;;  %v2829_v60 = vmul.f32 1.0614054, %v7088_v58  ;;  %v7090_v5 = vpop.eup %7089  ;;  %v6087_v56 = vld [vmem:[%s8351_s5 + $0x180] sm:$0xff] }
 0x7ba   :  { %v7092_v14 = vpop.eup %7091 }
 0x7bb   :  { %v2834_v61 = vmul.f32 %v7086_v54, %v2832_v59  ;;  %v2831_v62 = vadd.f32 -1.4531521, %v2829_v60  ;;  %v6106_v59 = vld [vmem:[%s8351_s5 + $0x218] sm:$0xff] }
 0x7bd   :  { %v2836_v63 = vadd.f32 1.4214138, %v2834_v61  ;;  %v2833_v10 = vmul.f32 %v7088_v58, %v2831_v62 }
 0x7bf   :  { %v2838_v0 = vmul.f32 %v7086_v54, %v2836_v63  ;;  %v2835_v1 = vadd.f32 1.4214138, %v2833_v10 }
 0x7c1   :  { %v2840_v12 = vadd.f32 -0.28449672, %v2838_v0  ;;  %v2837_v41 = vmul.f32 %v7088_v58, %v2835_v1  ;;  %v6008_v1 = vld [vmem:[%s8348_s2 + $0x48] sm:$0xff] }
 0x7c3   :  { %v2842_v37 = vmul.f32 %v7086_v54, %v2840_v12  ;;  %v2839_v15 = vadd.f32 -0.28449672, %v2837_v41 }
 0x7c5   :  { %v2844_v2 = vadd.f32 0.2548296, %v2842_v37  ;;  %v2841_v3 = vmul.f32 %v7088_v58, %v2839_v15  ;;  %v6007_v37 = vld [vmem:[%s8348_s2 + $0x40] sm:$0xff] }
 0x7c7   :  { %v2846_v4 = vmul.f32 %v7086_v54, %v2844_v2  ;;  %v2843_v6 = vadd.f32 0.2548296, %v2841_v3  ;;  %v6088_v54 = vld [vmem:[%s8351_s5 + $0x188] sm:$0xff]  ;;  %v6009_v3 = vld [vmem:[%s8348_s2 + $0x50] sm:$0xff] }
 0x7c9   :  { %v2856_v7 = vmul.f32 %v7090_v5, %v2846_v4  ;;  %v2845_v8 = vmul.f32 %v7088_v58, %v2843_v6  ;;  %v6094_v58 = vld [vmem:[%s8351_s5 + $0x1b8] sm:$0xff] }
 0x7ca   :  { %v6010_v4 = vld [vmem:[%s8348_s2 + $0x58] sm:$0xff] }
 0x7cb   :  { %v2858_v11 = vsub.f32 1.0, %v2856_v7  ;;  %v2855_v13 = vmul.f32 %v7092_v14, %v2845_v8  ;;  %v6093_v8 = vld [vmem:[%s8351_s5 + $0x1b0] sm:$0xff] }
 0x7cc   :  { %v6105_v14 = vld [vmem:[%s8351_s5 + $0x210] sm:$0xff] }
 0x7cd   :  { %v2862_v17 = vsub.f32 0.0, %v2858_v11  ;;  %v2857_v18 = vsub.f32 1.0, %v2855_v13  ;;  %v6104_v13 = vld [vmem:[%s8351_s5 + $0x208] sm:$0xff] }
 0x7cf   :  { %v2864_v19 = vsel %vm2860_vm3, %v2858_v11, %v2862_v17  ;;  %v2861_v20 = vsub.f32 0.0, %v2857_v18  ;;  %v6092_v11 = vld [vmem:[%s8351_s5 + $0x1a8] sm:$0xff]  ;;  %v6091_v17 = vld [vmem:[%s8351_s5 + $0x1a0] sm:$0xff] }
 0x7d0   :  { %v2866_v21 = vadd.f32 1.0, %v2864_v19  ;;  %v6102_v19 = vld [vmem:[%s8351_s5 + $0x1f8] sm:$0xff] }
 0x7d1   :  { %v2863_v22 = vsel %vm2859_vm4, %v2857_v18, %v2861_v20  ;;  %v6103_v18 = vld [vmem:[%s8351_s5 + $0x200] sm:$0xff]  ;;  %v6114_v20 = vld [vmem:[%s8351_s5 + $0x258] sm:$0xff] }
 0x7d2   :  { %v2865_v24 = vadd.f32 1.0, %v2863_v22  ;;  %v2868_v29 = vmul.f32 %v2866_v21, %v2816_v27  ;;  %v6101_v21 = vld [vmem:[%s8351_s5 + $0x1f0] sm:$0xff]  ;;  %v6099_v27 = vld [vmem:[%s8351_s5 + $0x1e0] sm:$0xff] }
 0x7d3   :  { %v6113_v22 = vld [vmem:[%s8351_s5 + $0x250] sm:$0xff] }
 0x7d4   :  { %v2867_v28 = vmul.f32 %v2865_v24, %v2815_v23  ;;  %v6100_v23 = vld [vmem:[%s8351_s5 + $0x1e8] sm:$0xff] }
 0x7d5   :  { %v6112_v24 = vld [vmem:[%s8351_s5 + $0x248] sm:$0xff] }
 0x7d6   :  { %6766 = vmatprep.mubr.msk.f32.mxu1 %vm2877_vm5, %v2867_v28  ;;  %v6111_v28 = vld [vmem:[%s8351_s5 + $0x240] sm:$0xff] }
 0x7d7   :  { %6767 = vmatmul.mubr.msk.f32.vlgmr.msra.gmra.mxu1 %vm2877_vm5, %v2868_v29  ;;  %v6110_v29 = vld [vmem:[%s8351_s5 + $0x238] sm:$0xff] }
 0x7d8   :  { %6792 = vmatpush3.msra.mxu1 %v6098_v51  ;;  %v6132_v51 = vld [vmem:[%s8351_s5 + $0x2e8] sm:$0xff] }
 0x7d9   :  { %6793 = vmatprep.subr.mxu1 %v6097_v53 }
 0x7da   :  { %6794 = vmatpush3.msra.mxu1 %v6097_v53 }
 0x7db   :  { %6795 = vmatprep.subr.mxu1 %v6096_v55 }
 0x7dc   :  { %6796 = vmatpush3.msra.mxu1 %v6096_v55 }
 0x7dd   :  { %6797 = vmatprep.subr.mxu1 %v6095_v57 }
 0x7de   :  { %6798 = vmatpush3.msra.mxu1 %v6095_v57  ;;  %v6143_v57 = vld [vmem:[%s8349_s3 + $0x100] sm:$0xff] }
 0x7df   :  { %6813 = vmatprep.subr.mxu1 %v6106_v59 }
 0x897   :  { %v6768_v31 = vpop.f32.mrf.mxu1 }
 0x898   :  { %v2956_v33 = vadd.f32 %v6768_v31, %v6014_v30  ;;  %v6122_v30 = vld [vmem:[%s8351_s5 + $0x298] sm:$0xff]  ;;  %v6109_v31 = vld [vmem:[%s8351_s5 + $0x230] sm:$0xff] }
 0x899   :  { %v2950_v34 = vpop.f32.mrf.mxu1 }
 0x89a   :  { %v2951_v35 = vadd.f32 %v6013_v32, %v2950_v34  ;;  %v2960_v36 = vadd.f32 %v2956_v33, %v7729_v26  ;;  %v6121_v32 = vld [vmem:[%s8351_s5 + $0x290] sm:$0xff]  ;;  %v6108_v33 = vld [vmem:[%s8351_s5 + $0x228] sm:$0xff] }
 0x89b   :  { %v6120_v34 = vld [vmem:[%s8351_s5 + $0x288] sm:$0xff] }
 0x89c   :  { %v2964_v38 = vsel %vm43_vm0, %v2960_v36, 0.0  ;;  %v2959_v39 = vadd.f32 %v2951_v35, %v7727_v25  ;;  %v6090_v25 = vld [vmem:[%s8351_s5 + $0x198] sm:$0xff]  ;;  %v6107_v35 = vld [vmem:[%s8351_s5 + $0x220] sm:$0xff] }
 0x89d   :  { %2965 = vadd.xlane.f32.xlu1 %v2964_v38  ;;  %6769 = vmatprep.subr.mxu0 %v6090_v25  ;;  %v6118_v38 = vld [vmem:[%s8351_s5 + $0x278] sm:$0xff] }
 0x89e   :  { %v2961_v40 = vsel %vm43_vm0, %v2959_v39, 0.0  ;;  %6770 = vmatpush3.msra.mxu0 %v6090_v25  ;;  %v6133_v25 = vld [vmem:[%s8351_s5 + $0x2f0] sm:$0xff] }
 0x89f   :  { %2962 = vadd.xlane.f32.xlu0 %v2961_v40  ;;  %6771 = vmatprep.subr.mxu0 %v6089_v52  ;;  %v6117_v40 = vld [vmem:[%s8351_s5 + $0x270] sm:$0xff] }
 0x8a0   :  { %6772 = vmatpush3.msra.mxu0 %v6089_v52  ;;  %v6131_v52 = vld [vmem:[%s8351_s5 + $0x2e0] sm:$0xff] }
 0x8a1   :  { %6773 = vmatprep.subr.mxu0 %v6088_v54 }
 0x8a2   :  { %6774 = vmatpush3.msra.mxu0 %v6088_v54 }
 0x8a3   :  { %6775 = vmatprep.subr.mxu0 %v6087_v56 }
 0x8a4   :  { %6776 = vmatpush3.msra.mxu0 %v6087_v56 }
 0x8a5   :  { %6780 = vmatprep.subr.mxu0 %v6094_v58 }
 0x926   :  { %v2966_v42 = vpop.xlane.xlu1 %2965 }
 0x927   :  { %v2968_v43 = vmul.f32 0.03125, %v2966_v42  ;;  %v6129_v42 = vld [vmem:[%s8351_s5 + $0x2d0] sm:$0xff] }
 0x928   :  { %v2963_v44 = vpop.xlane.xlu0 %2962 }
 0x929   :  { %v2970_v45 = vsub.f32 %v2960_v36, %v2968_v43  ;;  %v2967_v46 = vmul.f32 0.03125, %v2963_v44  ;;  %v6119_v36 = vld [vmem:[%s8351_s5 + $0x280] sm:$0xff]  ;;  %v6116_v43 = vld [vmem:[%s8351_s5 + $0x268] sm:$0xff] }
 0x92a   :  { %v6128_v44 = vld [vmem:[%s8351_s5 + $0x2c8] sm:$0xff] }
 0x92b   :  { %v2969_v47 = vsub.f32 %v2959_v39, %v2967_v46  ;;  %v2972_v48 = vmul.f32 %v2970_v45, %v2970_v45  ;;  %v6130_v39 = vld [vmem:[%s8351_s5 + $0x2d8] sm:$0xff]  ;;  %v6127_v46 = vld [vmem:[%s8351_s5 + $0x2c0] sm:$0xff] }
 0x92d   :  { %v2976_v49 = vsel %vm43_vm0, %v2972_v48, 0.0  ;;  %v2971_v50 = vmul.f32 %v2969_v47, %v2969_v47  ;;  %v6125_v48 = vld [vmem:[%s8351_s5 + $0x2b0] sm:$0xff] }
 0x92e   :  { %2977 = vadd.xlane.f32.xlu1 %v2976_v49  ;;  %v6124_v49 = vld [vmem:[%s8351_s5 + $0x2a8] sm:$0xff] }
 0x92f   :  { %v2973_v26 = vsel %vm43_vm0, %v2971_v50, 0.0  ;;  %v6123_v50 = vld [vmem:[%s8351_s5 + $0x2a0] sm:$0xff] }
 0x930   :  { %2974 = vadd.xlane.f32.xlu0 %v2973_v26  ;;  %v6134_v26 = vld [vmem:[%s8351_s5 + $0x2f8] sm:$0xff] }
 0x9b7   :  { %v2978_v60 = vpop.xlane.xlu1 %2977 }
 0x9b8   :  { %v2980_v9 = vmul.f32 0.03125, %v2978_v60  ;;  %v6135_v60 = vld [vmem:[%s8349_s3 + $0xc0] sm:$0xff] }
 0x9b9   :  { %v2975_v61 = vpop.xlane.xlu0 %2974 }
 0x9ba   :  { %v2982_v62 = vadd.f32 1e-05, %v2980_v9  ;;  %v2979_v63 = vmul.f32 0.03125, %v2975_v61  ;;  %v6144_v61 = vld [vmem:[%s8349_s3 + $0x108] sm:$0xff] }
 0x9bc   :  { %7093 = vrsqrt.f32 %v2982_v62  ;;  %v2981_v10 = vadd.f32 1e-05, %v2979_v63  ;;  %v6136_v63 = vld [vmem:[%s8349_s3 + $0xc8] sm:$0xff] }
 0x9be   :  { %7095 = vrsqrt.f32 %v2981_v10 }
 0x9c9   :  { %v7094_v0 = vpop.eup %7093 }
 0x9ca   :  { %v2986_v12 = vmul.f32 %v7094_v0, %v2970_v45  ;;  %v6115_v45 = vld [vmem:[%s8351_s5 + $0x260] sm:$0xff] }
 0x9cb   :  { %v7096_v41 = vpop.eup %7095 }
 0x9cc   :  { %v2985_v15 = vmul.f32 %v7096_v41, %v2969_v47  ;;  %v2988_v2 = vmul.f32 %v6008_v1, %v2986_v12  ;;  %v6126_v47 = vld [vmem:[%s8351_s5 + $0x2b8] sm:$0xff] }
 0x9ce   :  { %v2987_v5 = vmul.f32 %v6007_v37, %v2985_v15  ;;  %v7823_v7 = vadd.f32 %v6010_v4, %v2988_v2  ;;  %v6146_v15 = vld [vmem:[%s8349_s3 + $0x118] sm:$0xff]  ;;  %v6145_v4 = vld [vmem:[%s8349_s3 + $0x110] sm:$0xff] }
 0x9d0   :  { %v7821_v6 = vadd.f32 %v6009_v3, %v2987_v5  ;;  %v6138_v5 = vld [vmem:[%s8349_s3 + $0xd8] sm:$0xff] }
 0x9d2   :  { %6777 = vmatprep.mubr.msk.f32.mxu0 %vm43_vm0, %v7821_v6  ;;  %6799 = vmatprep.mubr.msk.f32.mxu1 %vm43_vm0, %v7821_v6 }
 0x9d3   :  { %6778 = vmatmul.mubr.msk.f32.vlgmr.msra.gmra.mxu0 %vm43_vm0, %v7823_v7  ;;  %6800 = vmatmul.mubr.msk.f32.vlgmr.msra.gmra.mxu1 %vm43_vm0, %v7823_v7 }
 0x9d4   :  { %6781 = vmatpush3.msra.mxu0 %v6094_v58  ;;  %6814 = vmatpush3.msra.mxu1 %v6106_v59 }
 0x9d5   :  { %6782 = vmatprep.subr.mxu0 %v6093_v8  ;;  %6788 = vmatprep.mubr.msk.f32.mxu0 %vm43_vm0, %v7821_v6 }
 0x9d6   :  { %6815 = vmatprep.subr.mxu1 %v6105_v14  ;;  %6821 = vmatprep.mubr.msk.f32.mxu1 %vm43_vm0, %v7821_v6 }
 0x9d7   :  { %6783 = vmatpush3.msra.mxu0 %v6093_v8  ;;  %6816 = vmatpush3.msra.mxu1 %v6105_v14  ;;  %v6148_v14 = vld [vmem:[%s8349_s3 + $0x128] sm:$0xff] }
 0x9d8   :  { %6784 = vmatprep.subr.mxu0 %v6092_v11  ;;  %6817 = vmatprep.subr.mxu1 %v6104_v13 }
 0x9d9   :  { %6785 = vmatpush3.msra.mxu0 %v6092_v11  ;;  %6818 = vmatpush3.msra.mxu1 %v6104_v13  ;;  %v6137_v13 = vld [vmem:[%s8349_s3 + $0xd0] sm:$0xff] }
 0x9da   :  { %6786 = vmatprep.subr.mxu0 %v6091_v17  ;;  %6819 = vmatprep.subr.mxu1 %v6103_v18 }
 0x9db   :  { %6787 = vmatpush3.msra.mxu0 %v6091_v17  ;;  %6820 = vmatpush3.msra.mxu1 %v6103_v18 }
 0x9dc   :  { %6789 = vmatmul.mubr.msk.f32.vlgmr.msra.gmra.mxu0 %vm43_vm0, %v7823_v7  ;;  %6802 = vmatprep.subr.mxu0 %v6102_v19 }
 0x9dd   :  { %6822 = vmatmul.mubr.msk.f32.vlgmr.msra.gmra.mxu1 %vm43_vm0, %v7823_v7  ;;  %6835 = vmatprep.subr.mxu1 %v6114_v20 }
 0x9de   :  { %6803 = vmatpush3.msra.mxu0 %v6102_v19  ;;  %6810 = vmatprep.mubr.msk.f32.mxu0 %vm43_vm0, %v7821_v6 }
 0x9df   :  { %6836 = vmatpush3.msra.mxu1 %v6114_v20  ;;  %6843 = vmatprep.mubr.msk.f32.mxu1 %vm43_vm0, %v7821_v6  ;;  %v6147_v20 = vld [vmem:[%s8349_s3 + $0x120] sm:$0xff] }
 0x9e0   :  { %6804 = vmatprep.subr.mxu0 %v6101_v21  ;;  %6837 = vmatprep.subr.mxu1 %v6113_v22 }
 0x9e1   :  { %6805 = vmatpush3.msra.mxu0 %v6101_v21  ;;  %6838 = vmatpush3.msra.mxu1 %v6113_v22  ;;  %v6140_v21 = vld [vmem:[%s8349_s3 + $0xe8] sm:$0xff] }
 0x9e2   :  { %6806 = vmatprep.subr.mxu0 %v6100_v23  ;;  %6839 = vmatprep.subr.mxu1 %v6112_v24 }
 0x9e3   :  { %6807 = vmatpush3.msra.mxu0 %v6100_v23  ;;  %6840 = vmatpush3.msra.mxu1 %v6112_v24  ;;  %v6139_v24 = vld [vmem:[%s8349_s3 + $0xe0] sm:$0xff] }
 0x9e4   :  { %6808 = vmatprep.subr.mxu0 %v6099_v27  ;;  %6841 = vmatprep.subr.mxu1 %v6111_v28 }
 0x9e5   :  { %6809 = vmatpush3.msra.mxu0 %v6099_v27  ;;  %6842 = vmatpush3.msra.mxu1 %v6111_v28 }
 0x9e6   :  { %6811 = vmatmul.mubr.msk.f32.vlgmr.msra.gmra.mxu0 %vm43_vm0, %v7823_v7  ;;  %6824 = vmatprep.subr.mxu0 %v6110_v29 }
 0x9e7   :  { %6844 = vmatmul.mubr.msk.f32.vlgmr.msra.gmra.mxu1 %vm43_vm0, %v7823_v7  ;;  %6857 = vmatprep.subr.mxu1 %v6122_v30 }
 0x9e8   :  { %6825 = vmatpush3.msra.mxu0 %v6110_v29  ;;  %6832 = vmatprep.mubr.msk.f32.mxu0 %vm43_vm0, %v7821_v6  ;;  %v6150_v29 = vld [vmem:[%s8349_s3 + $0x138] sm:$0xff] }
 0x9e9   :  { %6858 = vmatpush3.msra.mxu1 %v6122_v30  ;;  %6865 = vmatprep.mubr.msk.f32.mxu1 %vm43_vm0, %v7821_v6 }
 0x9ea   :  { %6826 = vmatprep.subr.mxu0 %v6109_v31  ;;  %6859 = vmatprep.subr.mxu1 %v6121_v32 }
 0x9eb   :  { %6827 = vmatpush3.msra.mxu0 %v6109_v31  ;;  %6860 = vmatpush3.msra.mxu1 %v6121_v32 }
 0x9ec   :  { %6828 = vmatprep.subr.mxu0 %v6108_v33  ;;  %6861 = vmatprep.subr.mxu1 %v6120_v34 }
 0x9ed   :  { %6829 = vmatpush3.msra.mxu0 %v6108_v33  ;;  %6862 = vmatpush3.msra.mxu1 %v6120_v34  ;;  %v6149_v33 = vld [vmem:[%s8349_s3 + $0x130] sm:$0xff]  ;;  %v6142_v34 = vld [vmem:[%s8349_s3 + $0xf8] sm:$0xff] }
 0x9ee   :  { %6830 = vmatprep.subr.mxu0 %v6107_v35  ;;  %6863 = vmatprep.subr.mxu1 %v6119_v36 }
 0x9ef   :  { %6831 = vmatpush3.msra.mxu0 %v6107_v35  ;;  %6864 = vmatpush3.msra.mxu1 %v6119_v36  ;;  %v6152_v36 = vld [vmem:[%s8349_s3 + $0x148] sm:$0xff] }
 0x9f0   :  { %6833 = vmatmul.mubr.msk.f32.vlgmr.msra.gmra.mxu0 %vm43_vm0, %v7823_v7  ;;  %6846 = vmatprep.subr.mxu0 %v6118_v38 }
 0x9f1   :  { %6866 = vmatmul.mubr.msk.f32.vlgmr.msra.gmra.mxu1 %vm43_vm0, %v7823_v7  ;;  %6879 = vmatprep.subr.mxu1 %v6130_v39 }
 0x9f2   :  { %6847 = vmatpush3.msra.mxu0 %v6118_v38  ;;  %6854 = vmatprep.mubr.msk.f32.mxu0 %vm43_vm0, %v7821_v6 }
 0x9f3   :  { %6880 = vmatpush3.msra.mxu1 %v6130_v39  ;;  %6887 = vmatprep.mubr.msk.f32.mxu1 %vm43_vm0, %v7821_v6  ;;  %v6141_v39 = vld [vmem:[%s8349_s3 + $0xf0] sm:$0xff] }
 0x9f4   :  { %6848 = vmatprep.subr.mxu0 %v6117_v40  ;;  %6881 = vmatprep.subr.mxu1 %v6129_v42 }
 0x9f5   :  { %6849 = vmatpush3.msra.mxu0 %v6117_v40  ;;  %6882 = vmatpush3.msra.mxu1 %v6129_v42 }
 0x9f6   :  { %6850 = vmatprep.subr.mxu0 %v6116_v43  ;;  %6883 = vmatprep.subr.mxu1 %v6128_v44 }
 0x9f7   :  { %6851 = vmatpush3.msra.mxu0 %v6116_v43  ;;  %6884 = vmatpush3.msra.mxu1 %v6128_v44  ;;  %v6151_v44 = vld [vmem:[%s8349_s3 + $0x140] sm:$0xff] }
 0x9f8   :  { %6852 = vmatprep.subr.mxu0 %v6115_v45  ;;  %6885 = vmatprep.subr.mxu1 %v6127_v46 }
 0x9f9   :  { %6853 = vmatpush3.msra.mxu0 %v6115_v45  ;;  %6886 = vmatpush3.msra.mxu1 %v6127_v46 }
 0x9fa   :  { %6855 = vmatmul.mubr.msk.f32.vlgmr.msra.gmra.mxu0 %vm43_vm0, %v7823_v7  ;;  %6868 = vmatprep.subr.mxu0 %v6126_v47 }
 0x9fb   :  { %6888 = vmatmul.mubr.msk.f32.vlgmr.msra.gmra.mxu1 %vm43_vm0, %v7823_v7  ;;  %6869 = vmatpush3.msra.mxu0 %v6126_v47 }
 0x9fc   :  { %6876 = vmatprep.mubr.msk.f32.mxu0 %vm43_vm0, %v7821_v6  ;;  %6870 = vmatprep.subr.mxu0 %v6125_v48 }
 0x9fd   :  { %6871 = vmatpush3.msra.mxu0 %v6125_v48  ;;  %6901 = vmatprep.subr.mxu1 %v7175_v16 }
 0x9fe   :  { %6872 = vmatprep.subr.mxu0 %v6124_v49  ;;  %6903 = vmatprep.mubr.msk.f32.mxu1 %vm7176_vm1, %v7175_v16 }
 0x9ff   :  { %6873 = vmatpush3.msra.mxu0 %v6124_v49 }
 0xa00   :  { %6874 = vmatprep.subr.mxu0 %v6123_v50 }
 0xa01   :  { %6875 = vmatpush3.msra.mxu0 %v6123_v50 }
 0xa02   :  { %6877 = vmatmul.mubr.msk.f32.vlgmr.msra.gmra.mxu0 %vm43_vm0, %v7823_v7  ;;  %6890 = vmatprep.subr.mxu0 %v6134_v26 }
 0xa03   :  { %6891 = vmatpush3.msra.mxu0 %v6134_v26  ;;  %6898 = vmatprep.mubr.msk.f32.mxu0 %vm43_vm0, %v7821_v6  ;;  %v7145_v26 = vld [vmem:[%s8347_s1] sm:$0xff] }
 0xa04   :  { %6892 = vmatprep.subr.mxu0 %v6133_v25 }
 0xa05   :  { %6893 = vmatpush3.msra.mxu0 %v6133_v25 }
 0xa06   :  { %6894 = vmatprep.subr.mxu0 %v6132_v51 }
 0xa07   :  { %6895 = vmatpush3.msra.mxu0 %v6132_v51 }
 0xa08   :  { %6896 = vmatprep.subr.mxu0 %v6131_v52 }
 0xa09   :  { %6897 = vmatpush3.msra.mxu0 %v6131_v52 }
 0xa0a   :  { %6899 = vmatmul.mubr.msk.f32.vlgmr.msra.gmra.mxu0 %vm43_vm0, %v7823_v7  ;;  %6911 = vmatprep.subr.mxu0 %v7175_v16 }
 0xa0b   :  { %6913 = vmatprep.mubr.msk.f32.mxu0 %vm7176_vm1, %v7175_v16 }
 0xa93   :  { %v6801_v53 = vpop.f32.mrf.mxu1  ;;  %v6779_v55 = vpop.f32.mrf.mxu0 }
 0xa94   :  { %v3161_v1 = vadd.f32 %v6779_v55, %v6136_v63  ;;  %v3311_v28 = vadd.f32 %v6801_v53, %v6140_v21 }
 0xa95   :  { %v3305_v54 = vpop.f32.mrf.mxu1  ;;  %v3155_v59 = vpop.f32.mrf.mxu0 }
 0xa96   :  { %v3156_v62 = vadd.f32 %v6135_v60, %v3155_v59  ;;  %v3306_v30 = vadd.f32 %v6139_v24, %v3305_v54  ;;  %v7146_v54 = vld [vmem:[%s8347_s1 + $0x8] sm:$0xff]  ;;  %v7152_v24 = vld [vmem:[%s8347_s1 + $0x30] sm:$0xff] }
 0xa9c   :  { %v6790_v10 = vpop.f32.mrf.mxu0 }
 0xa9d   :  { %v6823_v56 = vpop.f32.mrf.mxu1  ;;  %v3236_v18 = vadd.f32 %v6790_v10, %v6138_v5 }
 0xa9e   :  { %v3461_v0 = vadd.f32 %v6823_v56, %v6144_v61  ;;  %v3230_v12 = vpop.f32.mrf.mxu0 }
 0xa9f   :  { %v3455_v58 = vpop.f32.mrf.mxu1  ;;  %v3231_v23 = vadd.f32 %v6137_v13, %v3230_v12 }
 0xaa0   :  { %v3456_v9 = vadd.f32 %v6143_v57, %v3455_v58 }
 0xaa2   :  { %6902 = vmatpush3.xpose.msk.msra.mxu1 %vm1079_vm2, %v3456_v9 }
 0xaa3   :  { %6906 = vmatprep.subr.mxu1 %v7175_v16 }
 0xaa5   :  { %6904 = vmatmul.mubr.msk.f32.vlgmr.msra.gmra.mxu1 %vm1079_vm2, %v3156_v62  ;;  %v7147_v62 = vld [vmem:[%s8347_s1 + $0x18] sm:$0xff] }
 0xaa6   :  { %6907 = vmatpush3.xpose.msk.msra.mxu1 %vm1079_vm2, %v3461_v0  ;;  %6908 = vmatprep.mubr.msk.f32.mxu1 %vm7176_vm1, %v7175_v16  ;;  %v6812_v41 = vpop.f32.mrf.mxu0 }
 0xaa7   :  { %6916 = vmatprep.subr.mxu1 %v7175_v16  ;;  %v6845_v2 = vpop.f32.mrf.mxu1  ;;  %v3386_v42 = vadd.f32 %v6812_v41, %v6142_v34 }
 0xaa8   :  { %v3380_v37 = vpop.f32.mrf.mxu0  ;;  %v3611_v22 = vadd.f32 %v6845_v2, %v6148_v14  ;;  %v7149_v2 = vld [vmem:[%s8347_s1 + $0x28] sm:$0xff]  ;;  %v7150_v14 = vld [vmem:[%s8347_s1 + $0x20] sm:$0xff] }
 0xaa9   :  { %6909 = vmatmul.mubr.msk.f32.vlgmr.msra.gmra.mxu1 %vm1079_vm2, %v3161_v1  ;;  %v3605_v19 = vpop.f32.mrf.mxu1  ;;  %v3381_v46 = vadd.f32 %v6141_v39, %v3380_v37  ;;  %v7148_v1 = vld [vmem:[%s8347_s1 + $0x10] sm:$0xff] }
 0xaaa   :  { %6918 = vmatprep.mubr.msk.f32.mxu1 %vm7176_vm1, %v7175_v16  ;;  %v3606_v27 = vadd.f32 %v6147_v20, %v3605_v19  ;;  %v7151_v20 = vld [vmem:[%s8347_s1 + $0x38] sm:$0xff] }
 0xab0   :  { %v6834_v3 = vpop.f32.mrf.mxu0 }
 0xab1   :  { %v3536_v8 = vadd.f32 %v6834_v3, %v6146_v15  ;;  %v6867_v31 = vpop.f32.mrf.mxu1 }
 0xab2   :  { %v3530_v11 = vpop.f32.mrf.mxu0  ;;  %v3761_v45 = vadd.f32 %v6867_v31, %v6152_v36 }
 0xab3   :  { %v3531_v17 = vadd.f32 %v6145_v4, %v3530_v11  ;;  %6917 = vmatpush3.xpose.msk.msra.mxu1 %vm1079_vm2, %v3536_v8  ;;  %v3755_v43 = vpop.f32.mrf.mxu1 }
 0xab4   :  { %6926 = vmatprep.subr.mxu1 %v7175_v16  ;;  %v3756_v47 = vadd.f32 %v6151_v44, %v3755_v43 }
 0xab5   :  { %6912 = vmatpush3.xpose.msk.msra.mxu0 %vm1079_vm2, %v3531_v17 }
 0xab6   :  { %6919 = vmatmul.mubr.msk.f32.vlgmr.msra.gmra.mxu1 %vm1079_vm2, %v3236_v18  ;;  %6921 = vmatprep.subr.mxu0 %v7175_v16 }
 0xab7   :  { %6927 = vmatpush3.xpose.msk.msra.mxu1 %vm1079_vm2, %v3611_v22  ;;  %6928 = vmatprep.mubr.msk.f32.mxu1 %vm7176_vm1, %v7175_v16 }
 0xab8   :  { %6914 = vmatmul.mubr.msk.f32.vlgmr.msra.gmra.mxu0 %vm1079_vm2, %v3231_v23  ;;  %6936 = vmatprep.subr.mxu1 %v7175_v16 }
 0xab9   :  { %6922 = vmatpush3.xpose.msk.msra.mxu0 %vm1079_vm2, %v3606_v27  ;;  %6923 = vmatprep.mubr.msk.f32.mxu0 %vm7176_vm1, %v7175_v16 }
 0xaba   :  { %v6856_v32 = vpop.f32.mrf.mxu0  ;;  %6929 = vmatmul.mubr.msk.f32.vlgmr.msra.gmra.mxu1 %vm1079_vm2, %v3311_v28  ;;  %6931 = vmatprep.subr.mxu0 %v7175_v16 }
 0xabb   :  { %v3686_v35 = vadd.f32 %v6856_v32, %v6150_v29  ;;  %6938 = vmatprep.mubr.msk.f32.mxu1 %vm7176_vm1, %v7175_v16  ;;  %v8089_v48 = vpop.f32.mrf.mxu1 }
 0xabc   :  { %v3680_v38 = vpop.f32.mrf.mxu0  ;;  %6924 = vmatmul.mubr.msk.f32.vlgmr.msra.gmra.mxu0 %vm1079_vm2, %v3306_v30 }
 0xabd   :  { %v3681_v40 = vadd.f32 %v6149_v33, %v3680_v38  ;;  %6937 = vmatpush3.xpose.msk.msra.mxu1 %vm1079_vm2, %v3686_v35  ;;  %6933 = vmatprep.mubr.msk.f32.mxu0 %vm7176_vm1, %v7175_v16  ;;  %v8091_v49 = vpop.f32.mrf.mxu1 }
 0xabe   :  { %6946 = vmatprep.subr.mxu1 %v7175_v16 }
 0xabf   :  { %6932 = vmatpush3.xpose.msk.msra.mxu0 %vm1079_vm2, %v3681_v40 }
 0xac0   :  { %6939 = vmatmul.mubr.msk.f32.vlgmr.msra.gmra.mxu1 %vm1079_vm2, %v3386_v42  ;;  %6941 = vmatprep.subr.mxu0 %v7175_v16 }
 0xac1   :  { %6947 = vmatpush3.msra.mxu1 %v3761_v45  ;;  %6948 = vmatprep.mubr.msk.f32.mxu1 %vm7176_vm1, %v7175_v16 }
 0xac2   :  { %6934 = vmatmul.mubr.msk.f32.vlgmr.msra.gmra.mxu0 %vm1079_vm2, %v3381_v46  ;;  %6956 = vmatprep.subr.mxu1 %v7175_v16  ;;  %v8100_v57 = vpop.f32.mrf.mxu0 }
 0xac3   :  { %6942 = vmatpush3.msra.mxu0 %v3756_v47  ;;  %6943 = vmatprep.mubr.msk.f32.mxu0 %vm7176_vm1, %v7175_v16 }
 0xac4   :  { %6951 = vmatprep.subr.mxu0 %v7175_v16  ;;  %v8103_v59 = vpop.f32.mrf.mxu0 }
 0xaca   :  { %v8105_v60 = vpop.f32.mrf.mxu0 }
 0xacc   :  { %v8107_v9 = vpop.f32.mrf.mxu0 }
 0xb65   :  { %v4061_v50 = vpop.f32.mrf.mxu1 }
 0xb66   :  { %v4062_v25 = vadd.f32 %v7145_v26, %v4061_v50 }
 0xb67   :  { %v6905_v51 = vpop.f32.mrf.mxu1 }
 0xb68   :  { %v4597_v52 = vsel %vm1079_vm2, %v4062_v25, -inf }
 0xb69   :  { %4598 = vmax.xlane.f32.xlu0 %v4597_v52  ;;  %v4137_v53 = vpop.f32.mrf.mxu1 }
 0xb6a   :  { %v4138_v55 = vadd.f32 %v7146_v54, %v4137_v53 }
 0xb6b   :  { %v6910_v56 = vpop.f32.mrf.mxu1 }
 0xb6c   :  { %v4600_v58 = vsel %vm1079_vm2, %v4138_v55, -inf }
 0xb6d   :  { %4601 = vmax.xlane.f32.xlu1 %v4600_v58 }
 0xb76   :  { %v4289_v61 = vpop.f32.mrf.mxu1 }
 0xb77   :  { %v4290_v63 = vadd.f32 %v7147_v62, %v4289_v61 }
 0xb78   :  { %v4213_v10 = vpop.f32.mrf.mxu0  ;;  %v6920_v0 = vpop.f32.mrf.mxu1 }
 0xb79   :  { %v4214_v12 = vadd.f32 %v7148_v1, %v4213_v10  ;;  %v4606_v41 = vsel %vm1079_vm2, %v4290_v63, -inf }
 0xb7a   :  { %v6915_v37 = vpop.f32.mrf.mxu0  ;;  %4607 = vmax.xlane.f32.xlu1 %v4606_v41  ;;  %v4441_v15 = vpop.f32.mrf.mxu1 }
 0xb7b   :  { %v4442_v3 = vadd.f32 %v7149_v2, %v4441_v15  ;;  %v4603_v4 = vsel %vm1079_vm2, %v4214_v12, -inf }
 0xb7c   :  { %v4365_v5 = vpop.f32.mrf.mxu0  ;;  %4604 = vmax.xlane.f32.xlu0 %v4603_v4  ;;  %v6930_v8 = vpop.f32.mrf.mxu1 }
 0xb7d   :  { %v4366_v11 = vadd.f32 %v7150_v14, %v4365_v5  ;;  %v4612_v13 = vsel %vm1079_vm2, %v4442_v3, -inf }
 0xb7e   :  { %v6925_v17 = vpop.f32.mrf.mxu0  ;;  %4613 = vmax.xlane.f32.xlu1 %v4612_v13  ;;  %v6153_v13 = vld [vmem:[%s8349_s3 + $0x150] sm:$0xff] }
 0xb7f   :  { %v4609_v18 = vsel %vm1079_vm2, %v4366_v11, -inf }
 0xb80   :  { %v4593_v19 = vpop.f32.mrf.mxu1  ;;  %4610 = vmax.xlane.f32.xlu0 %v4609_v18 }
 0xb81   :  { %v4594_v21 = vadd.f32 %v7151_v20, %v4593_v19  ;;  %v3831_v19 = vadd.f32 %v6153_v13, %v8103_v59  ;;  %v6154_v20 = vld [vmem:[%s8349_s3 + $0x158] sm:$0xff] }
 0xb82   :  { %v4517_v22 = vpop.f32.mrf.mxu0  ;;  %v6940_v23 = vpop.f32.mrf.mxu1 }
 0xb83   :  { %v4518_v27 = vadd.f32 %v7152_v24, %v4517_v22  ;;  %v4618_v28 = vsel %vm1079_vm2, %v4594_v21, -inf }
 0xb84   :  { %v6935_v29 = vpop.f32.mrf.mxu0  ;;  %4619 = vmax.xlane.f32.xlu1 %v4618_v28 }
 0xb85   :  { %v4615_v30 = vsel %vm1079_vm2, %v4518_v27, -inf }
 0xb86   :  { %4616 = vmax.xlane.f32.xlu0 %v4615_v30 }
 0xbf2   :  { %v4599_v31 = vpop.xlane.xlu0 %4598 }
 0xbf3   :  { %v4621_v32 = vsub.f32 %v4062_v25, %v4599_v31 }
 0xbf5   :  { %v4629_v33 = vmul.f32 1.442695, %v4621_v32  ;;  %v6155_v32 = vld [vmem:[%s8349_s3 + $0x160] sm:$0xff] }
 0xbf6   :  { %v4602_v34 = vpop.xlane.xlu1 %4601 }
 0xbf7   :  { %7097 = vpow2.f32 %v4629_v33  ;;  %v4622_v35 = vsub.f32 %v4138_v55, %v4602_v34 }
 0xbf9   :  { %v4631_v36 = vmul.f32 1.442695, %v4622_v35 }
 0xbfb   :  { %7099 = vpow2.f32 %v4631_v36  ;;  %v6158_v36 = vld [vmem:[%s8349_s3 + $0x178] sm:$0xff] }
 0xc03   :  { %v4608_v38 = vpop.xlane.xlu1 %4607 }
 0xc04   :  { %v7098_v39 = vpop.eup %7097  ;;  %v4624_v40 = vsub.f32 %v4290_v63, %v4608_v38 }
 0xc05   :  { %v4605_v42 = vpop.xlane.xlu0 %4604  ;;  %v4645_v43 = vsel %vm1079_vm2, %v7098_v39, 0.0 }
 0xc06   :  { %v4635_v44 = vmul.f32 1.442695, %v4624_v40  ;;  %v4623_v45 = vsub.f32 %v4214_v12, %v4605_v42  ;;  %4646 = vadd.xlane.f32.xlu0 %v4645_v43  ;;  %v3906_v40 = vadd.f32 %v6155_v32, %v8091_v49  ;;  %v6157_v42 = vld [vmem:[%s8349_s3 + $0x170] sm:$0xff] }
 0xc07   :  { %v4614_v46 = vpop.xlane.xlu1 %4613 }
 0xc08   :  { %v7100_v47 = vpop.eup %7099  ;;  %7101 = vpow2.f32 %v4635_v44  ;;  %v4633_v50 = vmul.f32 1.442695, %v4623_v45  ;;  %v4626_v26 = vsub.f32 %v4442_v3, %v4614_v46  ;;  %v3986_v44 = vadd.f32 %v8105_v60, %v6158_v36 }
 0xc09   :  { %v4611_v25 = vpop.xlane.xlu0 %4610  ;;  %v4648_v51 = vsel %vm1079_vm2, %v7100_v47, 0.0  ;;  %v3981_v45 = vadd.f32 %v6157_v42, %v8107_v9  ;;  %v6207_v9 = vld [vmem:[%s8352_s6 + $0x20] sm:$0xff]  ;;  %v6221_v42 = vld [vmem:[%s8353_s7 + $0x30] sm:$0xff] }
 0xc0a   :  { %7103 = vpow2.f32 %v4633_v50  ;;  %v4639_v52 = vmul.f32 1.442695, %v4626_v26  ;;  %v4625_v53 = vsub.f32 %v4366_v11, %v4611_v25  ;;  %4649 = vadd.xlane.f32.xlu1 %v4648_v51  ;;  %v6208_v26 = vld [vmem:[%s8352_s6 + $0x28] sm:$0xff]  ;;  %v6209_v25 = vld [vmem:[%s8352_s6 + $0x30] sm:$0xff]  ;;  %v6210_v51 = vld [vmem:[%s8352_s6 + $0x38] sm:$0xff] }
 0xc0c   :  { %7105 = vpow2.f32 %v4639_v52  ;;  %v4637_v54 = vmul.f32 1.442695, %v4625_v53 }
 0xc0d   :  { %v4620_v55 = vpop.xlane.xlu1 %4619 }
 0xc0e   :  { %7107 = vpow2.f32 %v4637_v54  ;;  %v4628_v56 = vsub.f32 %v4594_v21, %v4620_v55 }
 0xc0f   :  { %v4617_v58 = vpop.xlane.xlu0 %4616 }
 0xc10   :  { %v4643_v61 = vmul.f32 1.442695, %v4628_v56  ;;  %v4627_v62 = vsub.f32 %v4518_v27, %v4617_v58  ;;  %v3836_v27 = vadd.f32 %v8100_v57, %v6154_v20  ;;  %v6156_v57 = vld [vmem:[%s8349_s3 + $0x168] sm:$0xff] }
 0xc11   :  { %v3911_v35 = vadd.f32 %v8089_v48, %v6156_v57 }
 0xc12   :  { %7109 = vpow2.f32 %v4643_v61  ;;  %v4641_v63 = vmul.f32 1.442695, %v4627_v62 }
 0xc14   :  { %7111 = vpow2.f32 %v4641_v63 }
 0xc15   :  { %v7102_v10 = vpop.eup %7101 }
 0xc16   :  { %v4654_v0 = vsel %vm1079_vm2, %v7102_v10, 0.0 }
 0xc17   :  { %v7104_v1 = vpop.eup %7103  ;;  %4655 = vadd.xlane.f32.xlu1 %v4654_v0 }
 0xc18   :  { %v4651_v12 = vsel %vm1079_vm2, %v7104_v1, 0.0 }
 0xc19   :  { %v7106_v41 = vpop.eup %7105  ;;  %4652 = vadd.xlane.f32.xlu0 %v4651_v12 }
 0xc1a   :  { %v4660_v37 = vsel %vm1079_vm2, %v7106_v41, 0.0 }
 0xc1b   :  { %v8138_v15 = vpop.eup %7107  ;;  %4661 = vadd.xlane.f32.xlu1 %v4660_v37 }
 0xc1c   :  { %v4657_v2 = vsel %vm1079_vm2, %v8138_v15, 0.0 }
 0xc1d   :  { %4658 = vadd.xlane.f32.xlu0 %v4657_v2 }
 0xc1f   :  { %v8142_v3 = vpop.eup %7109 }
 0xc20   :  { %v4666_v4 = vsel %vm1079_vm2, %v8142_v3, 0.0 }
 0xc21   :  { %v8146_v5 = vpop.eup %7111  ;;  %4667 = vadd.xlane.f32.xlu1 %v4666_v4 }
 0xc22   :  { %v4663_v8 = vsel %vm1079_vm2, %v8146_v5, 0.0 }
 0xc23   :  { %4664 = vadd.xlane.f32.xlu0 %v4663_v8 }
 0xc8f   :  { %v4647_v14 = vpop.xlane.xlu0 %4646 }
 0xc90   :  { %7113 = vrcp.f32 %v4647_v14 }
 0xc93   :  { %v4650_v11 = vpop.xlane.xlu1 %4649 }
 0xc94   :  { %7115 = vrcp.f32 %v4650_v11 }
 0xc9d   :  { %v7114_v17 = vpop.eup %7113 }
 0xc9e   :  { %v4677_v18 = vmul.f32 %v7114_v17, %v7098_v39 }
 0xca0   :  { %v4656_v21 = vpop.xlane.xlu1 %4655  ;;  %6944 = vmatmul.mubr.msk.f32.vlgmr.msra.gmra.mxu0 %vm1079_vm2, %v4677_v18  ;;  %v6084_v18 = vld [vmem:[%s8348_s2 + $0xc8] sm:$0xff] }
 0xca1   :  { %v7116_v22 = vpop.eup %7115  ;;  %7117 = vrcp.f32 %v4656_v21  ;;  %6952 = vmatpush3.msra.mxu0 %v3831_v19  ;;  %6953 = vmatprep.mubr.msk.f32.mxu0 %vm7176_vm1, %v7175_v16 }
 0xca2   :  { %v4653_v23 = vpop.xlane.xlu0 %4652  ;;  %v4678_v24 = vmul.f32 %v7116_v22, %v7100_v47  ;;  %6961 = vmatprep.subr.mxu0 %v7175_v16  ;;  %v6083_v22 = vld [vmem:[%s8348_s2 + $0xc0] sm:$0xff] }
 0xca3   :  { %7119 = vrcp.f32 %v4653_v23 }
 0xca4   :  { %v4662_v59 = vpop.xlane.xlu1 %4661  ;;  %6949 = vmatmul.mubr.msk.f32.vlgmr.msra.gmra.mxu1 %vm1079_vm2, %v4678_v24 }
 0xca5   :  { %7121 = vrcp.f32 %v4662_v59  ;;  %6957 = vmatpush3.msra.mxu1 %v3836_v27  ;;  %6958 = vmatprep.mubr.msk.f32.mxu1 %vm7176_vm1, %v7175_v16 }
 0xca6   :  { %v4659_v28 = vpop.xlane.xlu0 %4658  ;;  %6966 = vmatprep.subr.mxu1 %v7175_v16 }
 0xca7   :  { %7123 = vrcp.f32 %v4659_v28 }
 0xcaa   :  { %v4668_v29 = vpop.xlane.xlu1 %4667 }
 0xcab   :  { %7125 = vrcp.f32 %v4668_v29 }
 0xcac   :  { %v4665_v30 = vpop.xlane.xlu0 %4664 }
 0xcad   :  { %7127 = vrcp.f32 %v4665_v30 }
 0xcae   :  { %v7118_v31 = vpop.eup %7117 }
 0xcaf   :  { %v4680_v33 = vmul.f32 %v7118_v31, %v7102_v10 }
 0xcb0   :  { %v7120_v34 = vpop.eup %7119 }
 0xcb1   :  { %6959 = vmatmul.mubr.msk.f32.vlgmr.msra.gmra.mxu1 %vm1079_vm2, %v4680_v33  ;;  %v4679_v38 = vmul.f32 %v7120_v34, %v7104_v1 }
 0xcb2   :  { %v7122_v39 = vpop.eup %7121  ;;  %6967 = vmatpush3.msra.mxu1 %v3911_v35  ;;  %6968 = vmatprep.mubr.msk.f32.mxu1 %vm7176_vm1, %v7175_v16 }
 0xcb3   :  { %6954 = vmatmul.mubr.msk.f32.vlgmr.msra.gmra.mxu0 %vm1079_vm2, %v4679_v38  ;;  %6976 = vmatprep.subr.mxu1 %v7175_v16  ;;  %v4682_v48 = vmul.f32 %v7122_v39, %v7106_v41 }
 0xcb4   :  { %v7124_v43 = vpop.eup %7123  ;;  %6962 = vmatpush3.msra.mxu0 %v3906_v40  ;;  %6963 = vmatprep.mubr.msk.f32.mxu0 %vm7176_vm1, %v7175_v16 }
 0xcb5   :  { %6969 = vmatmul.mubr.msk.f32.vlgmr.msra.gmra.mxu1 %vm1079_vm2, %v4682_v48  ;;  %6971 = vmatprep.subr.mxu0 %v7175_v16  ;;  %v4681_v49 = vmul.f32 %v7124_v43, %v8138_v15  ;;  %v6220_v48 = vld [vmem:[%s8353_s7 + $0x28] sm:$0xff]  ;;  %v6219_v43 = vld [vmem:[%s8353_s7 + $0x20] sm:$0xff] }
 0xcb6   :  { %6977 = vmatpush3.msra.mxu1 %v3986_v44  ;;  %6978 = vmatprep.mubr.msk.f32.mxu1 %vm7176_vm1, %v7175_v16 }
 0xcb7   :  { %6964 = vmatmul.mubr.msk.f32.vlgmr.msra.gmra.mxu0 %vm1079_vm2, %v4681_v49  ;;  %6986 = vmatprep.subr.mxu1 %v6208_v26 }
 0xcb8   :  { %v7126_v46 = vpop.eup %7125  ;;  %6972 = vmatpush3.msra.mxu0 %v3981_v45  ;;  %6973 = vmatprep.mubr.msk.f32.mxu0 %vm7176_vm1, %v7175_v16 }
 0xcb9   :  { %v4684_v60 = vmul.f32 %v7126_v46, %v8142_v3  ;;  %6981 = vmatprep.subr.mxu0 %v6207_v9 }
 0xcba   :  { %v7128_v47 = vpop.eup %7127 }
 0xcbb   :  { %6979 = vmatmul.mubr.msk.f32.vlgmr.msra.gmra.mxu1 %vm1079_vm2, %v4684_v60  ;;  %v4683_v50 = vmul.f32 %v7128_v47, %v8146_v5 }
 0xcbc   :  { %6987 = vmatpush3.msra.mxu1 %v6208_v26  ;;  %v6076_v26 = vld [vmem:[%s8348_s2 + $0x88] sm:$0xff] }
 0xcbd   :  { %6974 = vmatmul.mubr.msk.f32.vlgmr.msra.gmra.mxu0 %vm1079_vm2, %v4683_v50  ;;  %6996 = vmatprep.subr.mxu1 %v6210_v51 }
 0xcbe   :  { %6982 = vmatpush3.msra.mxu0 %v6207_v9 }
 0xcbf   :  { %6991 = vmatprep.subr.mxu0 %v6209_v25 }
 0xd60   :  { %v4754_v52 = vpop.f32.mrf.mxu0 }
 0xd61   :  { %6983 = vmatprep.mubr.msk.f32.mxu0 %vm1079_vm2, %v4754_v52 }
 0xd62   :  { %v6945_v53 = vpop.f32.mrf.mxu0 }
 0xd63   :  { %v6077_v53 = vld [vmem:[%s8348_s2 + $0x90] sm:$0xff] }
 0xd64   :  { %v4827_v54 = vpop.f32.mrf.mxu1 }
 0xd65   :  { %6984 = vmatmul.mubr.msk.f32.vlgmr.msra.gmra.mxu0 %vm1079_vm2, %v4827_v54 }
 0xd66   :  { %v6950_v55 = vpop.f32.mrf.mxu1  ;;  %6992 = vmatpush3.msra.mxu0 %v6209_v25 }
 0xd71   :  { %v4973_v56 = vpop.f32.mrf.mxu1 }
 0xd73   :  { %v4900_v58 = vpop.f32.mrf.mxu0  ;;  %v6960_v61 = vpop.f32.mrf.mxu1 }
 0xd74   :  { %6988 = vmatprep.mubr.msk.f32.mxu1 %vm1079_vm2, %v4900_v58 }
 0xd75   :  { %v6955_v62 = vpop.f32.mrf.mxu0  ;;  %v5119_v63 = vpop.f32.mrf.mxu1  ;;  %6989 = vmatmul.mubr.msk.f32.vlgmr.msra.gmra.mxu1 %vm1079_vm2, %v4973_v56  ;;  %v6078_v56 = vld [vmem:[%s8348_s2 + $0x98] sm:$0xff] }
 0xd76   :  { %6997 = vmatpush3.msra.mxu1 %v6210_v51  ;;  %v6075_v51 = vld [vmem:[%s8348_s2 + $0x80] sm:$0xff]  ;;  %v6234_v62 = vld [vmem:[%s8354_s8 + $0x78] sm:$0xff] }
 0xd77   :  { %v5046_v10 = vpop.f32.mrf.mxu0  ;;  %v6970_v0 = vpop.f32.mrf.mxu1  ;;  %7012 = vmatprep.subr.mxu1 %v6234_v62 }
 0xd78   :  { %6993 = vmatprep.mubr.msk.f32.mxu0 %vm1079_vm2, %v5046_v10  ;;  %v6232_v10 = vld [vmem:[%s8354_s8 + $0x68] sm:$0xff]  ;;  %v6231_v0 = vld [vmem:[%s8354_s8 + $0x60] sm:$0xff] }
 0xd79   :  { %v6965_v1 = vpop.f32.mrf.mxu0  ;;  %6994 = vmatmul.mubr.msk.f32.vlgmr.msra.gmra.mxu0 %vm1079_vm2, %v5119_v63  ;;  %v6233_v63 = vld [vmem:[%s8354_s8 + $0x70] sm:$0xff] }
 0xd7a   :  { %v6230_v1 = vld [vmem:[%s8354_s8 + $0x58] sm:$0xff] }
 0xd7b   :  { %v5265_v12 = vpop.f32.mrf.mxu1 }
 0xd7d   :  { %v5192_v41 = vpop.f32.mrf.mxu0  ;;  %v6980_v37 = vpop.f32.mrf.mxu1 }
 0xd7e   :  { %6998 = vmatprep.mubr.msk.f32.mxu1 %vm1079_vm2, %v5192_v41  ;;  %v6228_v41 = vld [vmem:[%s8354_s8 + $0x48] sm:$0xff]  ;;  %v6227_v37 = vld [vmem:[%s8354_s8 + $0x40] sm:$0xff] }
 0xd7f   :  { %v6975_v15 = vpop.f32.mrf.mxu0  ;;  %6999 = vmatmul.mubr.msk.f32.vlgmr.msra.gmra.mxu1 %vm1079_vm2, %v5265_v12  ;;  %v6229_v12 = vld [vmem:[%s8354_s8 + $0x50] sm:$0xff] }
 0xd80   :  { %7013 = vmatpush3.msra.mxu1 %v6234_v62  ;;  %v6224_v15 = vld [vmem:[%s8350_s4 + $0x18] sm:$0xff] }
 0xd81   :  { %7014 = vmatprep.subr.mxu1 %v6233_v63 }
 0xd82   :  { %7015 = vmatpush3.msra.mxu1 %v6233_v63 }
 0xd83   :  { %7016 = vmatprep.subr.mxu1 %v6232_v10 }
 0xd84   :  { %7017 = vmatpush3.msra.mxu1 %v6232_v10 }
 0xd85   :  { %7018 = vmatprep.subr.mxu1 %v6231_v0 }
 0xd86   :  { %7019 = vmatpush3.msra.mxu1 %v6231_v0  ;;  %v6086_v0 = vld [vmem:[%s8348_s2 + $0xd8] sm:$0xff] }
 0xd87   :  { %7020 = vmatprep.subr.mxu1 %v6230_v1 }
 0xd88   :  { %7021 = vmatpush3.msra.mxu1 %v6230_v1 }
 0xd89   :  { %7022 = vmatprep.subr.mxu1 %v6229_v12 }
 0xd8a   :  { %7023 = vmatpush3.msra.mxu1 %v6229_v12  ;;  %v6085_v12 = vld [vmem:[%s8348_s2 + $0xd0] sm:$0xff] }
 0xd8b   :  { %7024 = vmatprep.subr.mxu1 %v6228_v41 }
 0xd8c   :  { %7025 = vmatpush3.msra.mxu1 %v6228_v41 }
 0xd8d   :  { %7026 = vmatprep.subr.mxu1 %v6227_v37 }
 0xd8e   :  { %7027 = vmatpush3.msra.mxu1 %v6227_v37 }
 0xe25   :  { %v6985_v2 = vpop.f32.mrf.mxu0 }
 0xe27   :  { %v5346_v3 = vpop.f32.mrf.mxu0 }
 0xe35   :  { %v6990_v4 = vpop.f32.mrf.mxu1 }
 0xe36   :  { %v5599_v14 = vadd.f32 %v6990_v4, %v6985_v2 }
 0xe37   :  { %v5427_v8 = vpop.f32.mrf.mxu1 }
 0xe38   :  { %v5598_v13 = vadd.f32 %v5427_v8, %v5346_v3  ;;  %v6223_v3 = vld [vmem:[%s8350_s4 + $0x10] sm:$0xff] }
 0xe39   :  { %v6995_v5 = vpop.f32.mrf.mxu0 }
 0xe3a   :  { %v5601_v17 = vadd.f32 %v6995_v5, %v5599_v14 }
 0xe3b   :  { %v5508_v11 = vpop.f32.mrf.mxu0 }
 0xe3c   :  { %v5600_v20 = vadd.f32 %v5598_v13, %v5508_v11 }
 0xe3f   :  { %v7000_v19 = vpop.f32.mrf.mxu1 }
 0xe40   :  { %v5603_v21 = vadd.f32 %v7000_v19, %v5601_v17 }
 0xe41   :  { %v5589_v23 = vpop.f32.mrf.mxu1 }
 0xe42   :  { %v5605_v24 = vadd.f32 %v6084_v18, %v5603_v21  ;;  %v5602_v27 = vadd.f32 %v5600_v20, %v5589_v23 }
 0xe44   :  { %v5604_v59 = vadd.f32 %v6083_v22, %v5602_v27  ;;  %v5607_v28 = vadd.f32 %v5605_v24, %v7823_v7 }
 0xe46   :  { %v5611_v29 = vsel %vm43_vm0, %v5607_v28, 0.0  ;;  %v5606_v30 = vadd.f32 %v5604_v59, %v7821_v6  ;;  %v6222_v6 = vld [vmem:[%s8353_s7 + $0x38] sm:$0xff] }
 0xe47   :  { %5612 = vadd.xlane.f32.xlu1 %v5611_v29  ;;  %7001 = vmatprep.subr.mxu0 %v6222_v6 }
 0xe48   :  { %v5608_v57 = vsel %vm43_vm0, %v5606_v30, 0.0  ;;  %7002 = vmatpush3.msra.mxu0 %v6222_v6 }
 0xe49   :  { %5609 = vadd.xlane.f32.xlu0 %v5608_v57  ;;  %7003 = vmatprep.subr.mxu0 %v6221_v42 }
 0xe4a   :  { %7004 = vmatpush3.msra.mxu0 %v6221_v42 }
 0xe4b   :  { %7005 = vmatprep.subr.mxu0 %v6220_v48 }
 0xe4c   :  { %7006 = vmatpush3.msra.mxu0 %v6220_v48 }
 0xe4d   :  { %7007 = vmatprep.subr.mxu0 %v6219_v43 }
 0xe4e   :  { %7008 = vmatpush3.msra.mxu0 %v6219_v43 }
 0xe4f   :  { %7031 = vmatprep.subr.mxu0 %v7175_v16 }
 0xed0   :  { %v5613_v31 = vpop.xlane.xlu1 %5612 }
 0xed1   :  { %v5615_v32 = vmul.f32 0.03125, %v5613_v31 }
 0xed2   :  { %v5610_v33 = vpop.xlane.xlu0 %5609 }
 0xed3   :  { %v5617_v34 = vsub.f32 %v5607_v28, %v5615_v32  ;;  %v5614_v35 = vmul.f32 0.03125, %v5610_v33 }
 0xed5   :  { %v5616_v36 = vsub.f32 %v5606_v30, %v5614_v35  ;;  %v5619_v38 = vmul.f32 %v5617_v34, %v5617_v34 }
 0xed7   :  { %v5623_v39 = vsel %vm43_vm0, %v5619_v38, 0.0  ;;  %v5618_v40 = vmul.f32 %v5616_v36, %v5616_v36 }
 0xed8   :  { %5624 = vadd.xlane.f32.xlu1 %v5623_v39 }
 0xed9   :  { %v5620_v7 = vsel %vm43_vm0, %v5618_v40, 0.0 }
 0xeda   :  { %5621 = vadd.xlane.f32.xlu0 %v5620_v7 }
 0xf61   :  { %v5625_v44 = vpop.xlane.xlu1 %5624 }
 0xf62   :  { %v5627_v49 = vmul.f32 0.03125, %v5625_v44 }
 0xf63   :  { %v5622_v45 = vpop.xlane.xlu0 %5621 }
 0xf64   :  { %v5629_v46 = vadd.f32 1e-05, %v5627_v49  ;;  %v5626_v60 = vmul.f32 0.03125, %v5622_v45 }
 0xf66   :  { %7129 = vrsqrt.f32 %v5629_v46  ;;  %v5628_v47 = vadd.f32 1e-05, %v5626_v60 }
 0xf68   :  { %7131 = vrsqrt.f32 %v5628_v47 }
 0xf73   :  { %v7130_v50 = vpop.eup %7129 }
 0xf74   :  { %v5633_v9 = vmul.f32 %v7130_v50, %v5617_v34 }
 0xf75   :  { %v7132_v25 = vpop.eup %7131 }
 0xf76   :  { %v5632_v52 = vmul.f32 %v7132_v25, %v5616_v36  ;;  %v5635_v54 = vmul.f32 %v6076_v26, %v5633_v9 }
 0xf78   :  { %v5634_v55 = vmul.f32 %v6075_v51, %v5632_v52  ;;  %v8260_v61 = vadd.f32 %v6078_v56, %v5635_v54 }
 0xf7a   :  { %v8258_v58 = vadd.f32 %v6077_v53, %v5634_v55 }
 0xf7c   :  { %7009 = vmatprep.mubr.msk.f32.mxu0 %vm43_vm0, %v8258_v58 }
 0xf7d   :  { %7010 = vmatmul.mubr.msk.f32.vlgmr.msra.gmra.mxu0 %vm43_vm0, %v8260_v61 }
 0xf7e   :  { %7039 = vmatprep.mubr.msk.f32.mxu0 %vm7176_vm1, %v7175_v16 }
0x103d   :  { %v7011_v2 = vpop.f32.mrf.mxu0 }
0x103e   :  { %v5724_v4 = vadd.f32 %v7011_v2, %v6224_v15 }
0x103f   :  { %v5718_v5 = vpop.f32.mrf.mxu0 }
0x1040   :  { %v5730_v8 = vmul.f32 0.70710677, %v5724_v4  ;;  %v5719_v14 = vadd.f32 %v6223_v3, %v5718_v5  ;;  %v5728_v62 = vmul.f32 0.5, %v5724_v4 }
0x1042   :  { %v5732_v11 = vand.u32 2147483647, %v5730_v8  ;;  %v5729_v13 = vmul.f32 0.70710677, %v5719_v14  ;;  %vm5772_vm6 = vcmp.ge.f32.partialorder %v5730_v8, 0.0  ;;  %v5727_v55 = vmul.f32 0.5, %v5719_v14 }
0x1044   :  { %v5734_v17 = vmul.f32 0.3275911, %v5732_v11  ;;  %v5731_v18 = vand.u32 2147483647, %v5729_v13  ;;  %v5760_v22 = vsub.f32 0.0, %v5732_v11  ;;  %vm5771_vm7 = vcmp.ge.f32.partialorder %v5729_v13, 0.0 }
0x1046   :  { %v5736_v19 = vadd.f32 1.0, %v5734_v17  ;;  %v5733_v20 = vmul.f32 0.3275911, %v5731_v18  ;;  %v5759_v23 = vsub.f32 0.0, %v5731_v18  ;;  %v5762_v24 = vmul.f32 %v5760_v22, %v5732_v11  ;;  %v5910_v22 = vld [vmem:[%s8355_s9 + $0x10] sm:$0xff] }
0x1048   :  { %7133 = vrcp.f32 %v5736_v19  ;;  %v5735_v21 = vadd.f32 1.0, %v5733_v20  ;;  %v5761_v59 = vmul.f32 %v5759_v23, %v5731_v18  ;;  %v5765_v29 = vmul.f32 1.442695, %v5762_v24  ;;  %v5909_v23 = vld [vmem:[%s8355_s9 + $0x8] sm:$0xff]  ;;  %v5908_v24 = vld [vmem:[%s8355_s9] sm:$0xff] }
0x104a   :  { %7135 = vrcp.f32 %v5735_v21  ;;  %v5763_v32 = vmul.f32 1.442695, %v5761_v59 }
0x104b   :  { %7137 = vpow2.f32 %v5765_v29 }
0x104c   :  { %7139 = vpow2.f32 %v5763_v32  ;;  %v6080_v32 = vld [vmem:[%s8348_s2 + $0xa8] sm:$0xff] }
0x1055   :  { %v7134_v27 = vpop.eup %7133 }
0x1056   :  { %v5742_v28 = vmul.f32 1.0614054, %v7134_v27 }
0x1057   :  { %v7136_v30 = vpop.eup %7135 }
0x1058   :  { %v5744_v57 = vadd.f32 -1.4531521, %v5742_v28  ;;  %v5741_v31 = vmul.f32 1.0614054, %v7136_v30  ;;  %v7138_v49 = vpop.eup %7137 }
0x1059   :  { %v7140_v47 = vpop.eup %7139 }
0x105a   :  { %v5746_v33 = vmul.f32 %v7134_v27, %v5744_v57  ;;  %v5743_v34 = vadd.f32 -1.4531521, %v5741_v31 }
0x105c   :  { %v5748_v35 = vadd.f32 1.4214138, %v5746_v33  ;;  %v5745_v36 = vmul.f32 %v7136_v30, %v5743_v34 }
0x105e   :  { %v5750_v38 = vmul.f32 %v7134_v27, %v5748_v35  ;;  %v5747_v39 = vadd.f32 1.4214138, %v5745_v36  ;;  %v6082_v35 = vld [vmem:[%s8348_s2 + $0xb8] sm:$0xff] }
0x1060   :  { %v5752_v40 = vadd.f32 -0.28449672, %v5750_v38  ;;  %v5749_v7 = vmul.f32 %v7136_v30, %v5747_v39  ;;  %v6081_v39 = vld [vmem:[%s8348_s2 + $0xb0] sm:$0xff] }
0x1062   :  { %v5754_v6 = vmul.f32 %v7134_v27, %v5752_v40  ;;  %v5751_v42 = vadd.f32 -0.28449672, %v5749_v7 }
0x1064   :  { %v5756_v48 = vadd.f32 0.2548296, %v5754_v6  ;;  %v5753_v43 = vmul.f32 %v7136_v30, %v5751_v42 }
0x1066   :  { %v5758_v44 = vmul.f32 %v7134_v27, %v5756_v48  ;;  %v5755_v45 = vadd.f32 0.2548296, %v5753_v43  ;;  %v5912_v43 = vld [vmem:[%s8355_s9 + $0x20] sm:$0x3] }
0x1068   :  { %v5768_v46 = vmul.f32 %v7138_v49, %v5758_v44  ;;  %v5757_v60 = vmul.f32 %v7136_v30, %v5755_v45 }
0x106a   :  { %v5770_v50 = vsub.f32 1.0, %v5768_v46  ;;  %v5767_v9 = vmul.f32 %v7140_v47, %v5757_v60 }
0x106c   :  { %v5774_v26 = vsub.f32 0.0, %v5770_v50  ;;  %v5769_v25 = vsub.f32 1.0, %v5767_v9 }
0x106e   :  { %v5776_v51 = vsel %vm5772_vm6, %v5770_v50, %v5774_v26  ;;  %v5773_v52 = vsub.f32 0.0, %v5769_v25 }
0x106f   :  { %v5778_v53 = vadd.f32 1.0, %v5776_v51 }
0x1070   :  { %v5775_v54 = vsel %vm5771_vm7, %v5769_v25, %v5773_v52 }
0x1071   :  { %v5777_v56 = vadd.f32 1.0, %v5775_v54  ;;  %v5780_v10 = vmul.f32 %v5778_v53, %v5728_v62 }
0x1073   :  { %v5779_v63 = vmul.f32 %v5777_v56, %v5727_v55 }
0x1075   :  { %7028 = vmatprep.mubr.msk.f32.mxu1 %vm2877_vm5, %v5779_v63 }
0x1076   :  { %7029 = vmatmul.mubr.msk.f32.vlgmr.msra.gmra.mxu1 %vm2877_vm5, %v5780_v10 }
0x1136   :  { %v7030_v1 = vpop.f32.mrf.mxu1 }
0x1137   :  { %v5868_v41 = vadd.f32 %v7030_v1, %v6086_v0 }
0x1138   :  { %v5862_v37 = vpop.f32.mrf.mxu1 }
0x1139   :  { %v5863_v15 = vadd.f32 %v6085_v12, %v5862_v37  ;;  %v5872_v2 = vadd.f32 %v5868_v41, %v8260_v61 }
0x113b   :  { %v5876_v3 = vsel %vm43_vm0, %v5872_v2, 0.0  ;;  %v5871_v4 = vadd.f32 %v5863_v15, %v8258_v58  ;;  %v5911_v58 = vld [vmem:[%s8355_s9 + $0x18] sm:$0xff] }
0x113c   :  { %5877 = vadd.xlane.f32.xlu0 %v5876_v3  ;;  %7032 = vmatpush3.msra.mxu0 %v5911_v58 }
0x113d   :  { %v5873_v5 = vsel %vm43_vm0, %v5871_v4, 0.0  ;;  %7033 = vmatprep.subr.mxu0 %v7175_v16 }
0x113e   :  { %5874 = vadd.xlane.f32.xlu1 %v5873_v5  ;;  %7034 = vmatpush3.msra.mxu0 %v5910_v22 }
0x113f   :  { %7035 = vmatprep.subr.mxu0 %v7175_v16 }
0x1140   :  { %7036 = vmatpush3.msra.mxu0 %v5909_v23 }
0x1141   :  { %7037 = vmatprep.subr.mxu0 %v7175_v16  ;;  %v6079_v16 = vld [vmem:[%s8348_s2 + $0xa0] sm:$0xff]  ;;  %s7153_s2 = scalar_lea.vmem %s5994_s15, 32 }
0x1142   :  { %7038 = vmatpush3.msra.mxu0 %v5908_v24  ;;  %p7154_p0 = scmp.ne.s32.totalorder %s5994_s15, %s7153_s2  ;;  %p7159_p2 = scmp.lt.s32.totalorder %s7153_s2, %s7153_s2 }
0x1144   :  { %p7160_p3 = por %p7159_p2, %p7158_p1 }
0x1146   :  { %p7161_p4 = pnand %p7160_p3, %p7154_p0 }
0x11c5   :  { %v5878_v8 = vpop.xlane.xlu0 %5877 }
0x11c6   :  { %v5880_v14 = vmul.f32 0.03125, %v5878_v8 }
0x11c7   :  { %v5875_v11 = vpop.xlane.xlu1 %5874 }
0x11c8   :  { %v5882_v13 = vsub.f32 %v5872_v2, %v5880_v14  ;;  %v5879_v17 = vmul.f32 0.03125, %v5875_v11 }
0x11ca   :  { %v5881_v18 = vsub.f32 %v5871_v4, %v5879_v17  ;;  %v5884_v19 = vmul.f32 %v5882_v13, %v5882_v13 }
0x11cc   :  { %v5888_v20 = vsel %vm43_vm0, %v5884_v19, 0.0  ;;  %v5883_v21 = vmul.f32 %v5881_v18, %v5881_v18 }
0x11cd   :  { %5889 = vadd.xlane.f32.xlu0 %v5888_v20 }
0x11ce   :  { %v5885_v61 = vsel %vm43_vm0, %v5883_v21, 0.0 }
0x11cf   :  { %5886 = vadd.xlane.f32.xlu1 %v5885_v61 }
0x1256   :  { %v5890_v27 = vpop.xlane.xlu0 %5889 }
0x1257   :  { %v5892_v59 = vmul.f32 0.03125, %v5890_v27 }
0x1258   :  { %v5887_v28 = vpop.xlane.xlu1 %5886 }
0x1259   :  { %v5894_v29 = vadd.f32 1e-05, %v5892_v59  ;;  %v5891_v30 = vmul.f32 0.03125, %v5887_v28 }
0x125b   :  { %7141 = vrsqrt.f32 %v5894_v29  ;;  %v5893_v57 = vadd.f32 1e-05, %v5891_v30 }
0x125d   :  { %7143 = vrsqrt.f32 %v5893_v57 }
0x1268   :  { %v7142_v31 = vpop.eup %7141 }
0x1269   :  { %v5898_v33 = vmul.f32 %v7142_v31, %v5882_v13 }
0x126a   :  { %v7144_v34 = vpop.eup %7143 }
0x126b   :  { %v5897_v36 = vmul.f32 %v7144_v34, %v5881_v18  ;;  %v5900_v38 = vmul.f32 %v6080_v32, %v5898_v33 }
0x126d   :  { %v5899_v40 = vmul.f32 %v6079_v16, %v5897_v36  ;;  %v5902_v7 = vadd.f32 %v6082_v35, %v5900_v38 }
0x126f   :  { %v5901_v6 = vadd.f32 %v6081_v39, %v5899_v40  ;;  %v5904_v42 = vrot.slane %v5902_v7, 7 }
0x1271   :  { %v5907_v48 = vsel %vm5906_vm8, %v5901_v6, %v5904_v42 }
0x1272   :  { %7040 = vmatmul.mubr.msk.f32.vlgmr.msra.gmra.mxu0 %vm43_vm0, %v5907_v48 }
0x1332   :  { %v5982_v44 = vpop.f32.mrf.mxu0 }
0x1333   :  { %v5983_v49 = vadd.f32 %v5982_v44, %v5912_v43 }
0x1334   :  { %v7041_v45 = vpop.f32.mrf.mxu0 }
0x1335   :  { %5986 = vst [vmem:[#allocation2] sm:$0x3] %v5983_v49 }
0x1336   :  { %7164 = shalt.err (!%p7161_p4)
}
0x1337   :  { %5996 = dma.vmem_to_hbm [thread:$0]  %s5994_s15, 32, %s8356_s10, [#allocation3]  }
0x1338   :  { %7173 = dma.done.wait [#allocation3], 32  }
0x1339   :  { %7174 = vsyncadd [#allocation3], 4294967264 }
0x133a   :  { %6000 = vsyncpa [#allocation3], 1 }

</bundles_post_ra>
